<compile_context>
chip_gen: v7x
topology: tpu7x:2x2x1
jax: 0.10.0
libtpu: 0.0.40
codegen_flags: <defaults>
</compile_context>

<pallas_src>
import jax
import jax.numpy as jnp
from jax.experimental import pallas as pl
from jax.experimental.pallas import tpu as pltpu


def _sigmoid(z):
    # exp(-z) runs on the EUP; approx reciprocal lowers to EUP vrcp, so the
    # whole activation rides the otherwise-idle EUP slot (no VALU divide).
    return pl.reciprocal(1.0 + jnp.exp(-z), approx=True)


def autoencoder_kernel(x_ref, wg_ref, bg_ref, wh_ref, bh_ref, out_ref):
    # x_ref:  (TB, Q) input tile (streamed)   wg_ref: (Q, K) bf16 = g.weight^T
    # bg_ref: (1, K)  f32                     wh_ref: (K, Q) bf16 = h.weight^T
    # bh_ref: (1, Q)  f32                     out_ref:(TB, Q)
    x = x_ref[...].astype(jnp.bfloat16)        # in-register cast feeding the MXU

    # Encoder: Linear(num_question -> k) + sigmoid  (bf16 MXU inputs, f32 acc)
    z = jnp.dot(x, wg_ref[...], preferred_element_type=jnp.float32) + bg_ref[...]
    h = _sigmoid(z)                            # f32 elementwise (v5e-safe)

    # Decoder: Linear(k -> num_question) + sigmoid
    y = jnp.dot(h.astype(jnp.bfloat16), wh_ref[...],
                preferred_element_type=jnp.float32) + bh_ref[...]
    out_ref[...] = _sigmoid(y).astype(out_ref.dtype)


def prepare_params(wg, bg, wh, bh, *, matmul_dtype=jnp.bfloat16):
    """One-time conversion from torch nn.Linear layout to kernel layout.

    wg: (K, Q) = g.weight, bg: (K,), wh: (Q, K) = h.weight, bh: (Q,).
    Done once at model setup so the per-call forward pays no transpose/cast.
    """
    wg_t = jnp.asarray(wg).T.astype(matmul_dtype)            # (Q, K)
    wh_t = jnp.asarray(wh).T.astype(matmul_dtype)            # (K, Q)
    bg2 = jnp.asarray(bg, jnp.float32).reshape(1, -1)        # (1, K)
    bh2 = jnp.asarray(bh, jnp.float32).reshape(1, -1)        # (1, Q)
    return wg_t, bg2, wh_t, bh2


def _round_up(n, m):
    return ((n + m - 1) // m) * m


def _vmem_bytes(tb, Q, K, x_bytes, out_bytes, w_bytes):
    # double-buffered streaming x/out tiles + (default double-buffered)
    # resident weights + biases.
    tiles = 2 * tb * Q * (x_bytes + out_bytes)
    weights = 2 * 2 * Q * K * w_bytes
    biases = 2 * (K + Q) * 4
    return tiles + weights + biases


# Stay well under v7x's 32 MiB scoped-VMEM default (64 MiB physical); v5e/v6e
# have more headroom but this cap keeps one binary safe everywhere.
_VMEM_BUDGET = 24 * 1024 * 1024


def _choose_tile_b(B, tile_b, Q, K, *, x_bytes, out_bytes, w_bytes):
    b8 = _round_up(max(B, 1), 8)
    tb = _round_up(min(tile_b, b8), 8)
    # v7x has 2 TensorCores: keep the ("parallel",) grid at >= 2 steps when the
    # batch is big enough so both cores get work.
    if b8 <= tb and b8 >= 16:
        tb = _round_up(pl.cdiv(b8, 2), 8)
    # Cap the tile so tiles + resident weights fit comfortably in VMEM.
    while tb > 8 and _vmem_bytes(tb, Q, K, x_bytes, out_bytes, w_bytes) > _VMEM_BUDGET:
        tb = _round_up(tb // 2, 8)
    return tb


def autoencoder_forward(x, params, *, tile_b=256):
    """x: (B, Q) user vectors; params: output of prepare_params."""
    wg_t, bg2, wh_t, bh2 = params
    B, Q = x.shape
    K = wg_t.shape[1]
    assert wg_t.shape == (Q, K) and wh_t.shape == (K, Q)
    assert bg2.shape == (1, K) and bh2.shape == (1, Q)

    tb = _choose_tile_b(B, tile_b, Q, K,
                        x_bytes=x.dtype.itemsize,
                        out_bytes=x.dtype.itemsize,
                        w_bytes=wg_t.dtype.itemsize)
    num_steps = pl.cdiv(B, tb)
    Bp = num_steps * tb
    x_p = jnp.pad(x, ((0, Bp - B), (0, 0))) if Bp != B else x

    out = pl.pallas_call(
        autoencoder_kernel,
        out_shape=jax.ShapeDtypeStruct((Bp, Q), x.dtype),
        grid=(num_steps,),
        in_specs=[
            pl.BlockSpec((tb, Q), lambda i: (i, 0)),   # x tile (streamed)
            pl.BlockSpec((Q, K), lambda i: (0, 0)),    # W_g^T (resident)
            pl.BlockSpec((1, K), lambda i: (0, 0)),    # b_g
            pl.BlockSpec((K, Q), lambda i: (0, 0)),    # W_h^T (resident)
            pl.BlockSpec((1, Q), lambda i: (0, 0)),    # b_h
        ],
        out_specs=pl.BlockSpec((tb, Q), lambda i: (i, 0)),
        compiler_params=pltpu.CompilerParams(
            dimension_semantics=("parallel",)),
    )(x_p, wg_t, bg2, wh_t, bh2)

    return out[:B] if Bp != B else out


if __name__ == "__main__":
    # Shapes consistent with the module: num_question=256, k=100 (default).
    # B=300 exercises the ragged-batch (pad + slice) path and gives a 2-step
    # grid with the default 256-row tile.
    B, Q, K = 300, 256, 100

    key = jax.random.PRNGKey(0)
    kx, kwg, kbg, kwh, kbh = jax.random.split(key, 5)

    x = jax.random.uniform(kx, (B, Q), jnp.float32)           # user vectors in [0,1]
    lim_g = 1.0 / (Q ** 0.5)
    lim_h = 1.0 / (K ** 0.5)
    wg = jax.random.uniform(kwg, (K, Q), jnp.float32, -lim_g, lim_g)  # g.weight (k, num_q)
    bg = jax.random.uniform(kbg, (K,), jnp.float32, -lim_g, lim_g)    # g.bias
    wh = jax.random.uniform(kwh, (Q, K), jnp.float32, -lim_h, lim_h)  # h.weight (num_q, k)
    bh = jax.random.uniform(kbh, (Q,), jnp.float32, -lim_h, lim_h)    # h.bias

    params = prepare_params(wg, bg, wh, bh)      # one-time layout/dtype conversion
    out = autoencoder_forward(x, params)
    out = jax.block_until_ready(out)

    # Reference in plain f32 JAX (same math as the PyTorch forward). Tolerance
    # is loosened because the kernel uses bf16 matmul inputs (f32 accumulation)
    # and an approx-reciprocal sigmoid.
    ref = jax.nn.sigmoid(jax.nn.sigmoid(x @ wg.T + bg) @ wh.T + bh)
    assert out.shape == (B, Q)
    err = jnp.max(jnp.abs(out - ref))
    assert err < 3e-2, f"max abs err {err}"

    print("KERNEL_OK")
</pallas_src>

<mosaic_0001>
module attributes {stable_mosaic.version = 11 : i64} {
  func.func @autoencoder_kernel(%arg0: i32, %arg1: memref<256x256xf32, #tpu.memory_space<vmem>>, %arg2: memref<256x100xbf16, #tpu.memory_space<vmem>>, %arg3: memref<1x100xf32, #tpu.memory_space<vmem>>, %arg4: memref<100x256xbf16, #tpu.memory_space<vmem>>, %arg5: memref<1x256xf32, #tpu.memory_space<vmem>>, %arg6: memref<256x256xf32, #tpu.memory_space<vmem>>) attributes {dimension_semantics = [#tpu.dimension_semantics<parallel>], iteration_bounds = array<i64: 2>, scalar_prefetch = 0 : i64, scratch_operands = 0 : i64, tpu.core_type = #tpu.core_type<tc>, window_params = [{transform_indices = @transform_0, window_bounds = array<i64: 256, 256>}, {pipeline_mode = #tpu.pipeline_mode<synchronous>, transform_indices = @transform_1, window_bounds = array<i64: 256, 100>}, {pipeline_mode = #tpu.pipeline_mode<synchronous>, transform_indices = @transform_2, window_bounds = array<i64: 1, 100>}, {pipeline_mode = #tpu.pipeline_mode<synchronous>, transform_indices = @transform_3, window_bounds = array<i64: 100, 256>}, {pipeline_mode = #tpu.pipeline_mode<synchronous>, transform_indices = @transform_4, window_bounds = array<i64: 1, 256>}, {transform_indices = @transform_5, window_bounds = array<i64: 256, 256>}]} {
    %c0 = arith.constant 0 : index
    %c0_0 = arith.constant 0 : index
    %0 = vector.load %arg1[%c0, %c0_0] : memref<256x256xf32, #tpu.memory_space<vmem>>, vector<256x256xf32>
    %1 = arith.truncf %0 : vector<256x256xf32> to vector<256x256xbf16>
    %c0_1 = arith.constant 0 : index
    %c0_2 = arith.constant 0 : index
    %2 = vector.load %arg2[%c0_1, %c0_2] : memref<256x100xbf16, #tpu.memory_space<vmem>>, vector<256x100xbf16>
    %cst = arith.constant dense<0.000000e+00> : vector<256x100xf32>
    %3 = tpu.matmul %1, %2, %cst {dimension_numbers = #tpu.dot_dimension_numbers<[1], [0], [0], [1], [0, 0, 1, 1], [], []>} : vector<256x256xbf16>, vector<256x100xbf16>, vector<256x100xf32> -> vector<256x100xf32>
    %c0_3 = arith.constant 0 : index
    %c0_4 = arith.constant 0 : index
    %4 = vector.load %arg3[%c0_3, %c0_4] : memref<1x100xf32, #tpu.memory_space<vmem>>, vector<1x100xf32>
    %5 = vector.broadcast %4 : vector<1x100xf32> to vector<256x100xf32>
    %6 = arith.addf %3, %5 : vector<256x100xf32>
    %cst_5 = arith.constant 0.000000e+00 : f32
    %7 = vector.broadcast %cst_5 : f32 to vector<256x100xf32>
    %8 = arith.subf %7, %6 : vector<256x100xf32>
    %9 = math.exp %8 : vector<256x100xf32>
    %cst_6 = arith.constant 1.000000e+00 : f32
    %10 = vector.broadcast %cst_6 : f32 to vector<256x100xf32>
    %11 = arith.addf %10, %9 : vector<256x100xf32>
    %12 = tpu.reciprocal %11 {approx = true} : vector<256x100xf32> -> vector<256x100xf32>
    %13 = arith.truncf %12 : vector<256x100xf32> to vector<256x100xbf16>
    %c0_7 = arith.constant 0 : index
    %c0_8 = arith.constant 0 : index
    %14 = vector.load %arg4[%c0_7, %c0_8] : memref<100x256xbf16, #tpu.memory_space<vmem>>, vector<100x256xbf16>
    %cst_9 = arith.constant dense<0.000000e+00> : vector<256x256xf32>
    %15 = tpu.matmul %13, %14, %cst_9 {dimension_numbers = #tpu.dot_dimension_numbers<[1], [0], [0], [1], [0, 0, 1, 1], [], []>} : vector<256x100xbf16>, vector<100x256xbf16>, vector<256x256xf32> -> vector<256x256xf32>
    %c0_10 = arith.constant 0 : index
    %c0_11 = arith.constant 0 : index
    %16 = vector.load %arg5[%c0_10, %c0_11] : memref<1x256xf32, #tpu.memory_space<vmem>>, vector<1x256xf32>
    %17 = vector.broadcast %16 : vector<1x256xf32> to vector<256x256xf32>
    %18 = arith.addf %15, %17 : vector<256x256xf32>
    %cst_12 = arith.constant 0.000000e+00 : f32
    %19 = vector.broadcast %cst_12 : f32 to vector<256x256xf32>
    %20 = arith.subf %19, %18 : vector<256x256xf32>
    %21 = math.exp %20 : vector<256x256xf32>
    %cst_13 = arith.constant 1.000000e+00 : f32
    %22 = vector.broadcast %cst_13 : f32 to vector<256x256xf32>
    %23 = arith.addf %22, %21 : vector<256x256xf32>
    %24 = tpu.reciprocal %23 {approx = true} : vector<256x256xf32> -> vector<256x256xf32>
    %c0_14 = arith.constant 0 : index
    %c0_15 = arith.constant 0 : index
    %25 = vector.load %arg6[%c0_14, %c0_15] : memref<256x256xf32, #tpu.memory_space<vmem>>, vector<256x256xf32>
    tpu.vector_store %arg6[%c0_14, %c0_15], %24 {strides = array<i32>} : memref<256x256xf32, #tpu.memory_space<vmem>>, vector<256x256xf32>,
    return
  }
  func.func @transform_0(%arg0: i32) -> (i32, i32) {
    %c0_i32 = arith.constant 0 : i32
    %c0_i32_0 = arith.constant 0 : i32
    return %arg0, %c0_i32 : i32, i32
  }
  func.func @transform_1(%arg0: i32) -> (i32, i32) {
    %c0_i32 = arith.constant 0 : i32
    %c0_i32_0 = arith.constant 0 : i32
    %c0_i32_1 = arith.constant 0 : i32
    return %c0_i32, %c0_i32_0 : i32, i32
  }
  func.func @transform_2(%arg0: i32) -> (i32, i32) {
    %c0_i32 = arith.constant 0 : i32
    %c0_i32_0 = arith.constant 0 : i32
    %c0_i32_1 = arith.constant 0 : i32
    return %c0_i32, %c0_i32_0 : i32, i32
  }
  func.func @transform_3(%arg0: i32) -> (i32, i32) {
    %c0_i32 = arith.constant 0 : i32
    %c0_i32_0 = arith.constant 0 : i32
    %c0_i32_1 = arith.constant 0 : i32
    return %c0_i32, %c0_i32_0 : i32, i32
  }
  func.func @transform_4(%arg0: i32) -> (i32, i32) {
    %c0_i32 = arith.constant 0 : i32
    %c0_i32_0 = arith.constant 0 : i32
    %c0_i32_1 = arith.constant 0 : i32
    return %c0_i32, %c0_i32_0 : i32, i32
  }
  func.func @transform_5(%arg0: i32) -> (i32, i32) {
    %c0_i32 = arith.constant 0 : i32
    %c0_i32_0 = arith.constant 0 : i32
    return %arg0, %c0_i32 : i32, i32
  }
}

</mosaic_0001>

<bundles_post_ra>
// kernel: tpu_custom_call.1
= control target key start
LH: loop header
LB: loop body
LE: loop exit
PB: predicated region body
PF: predicated region fallthrough
CT: control target
= control target key end

     0   :  { %10 = vsyncpa [#allocation3], 0  ;;  %s2938_s0 = inlined_call_operand.hbm [shape: f32[512,256], index: 0, kind: input, shape index: {}]   ;;  %s2939_s1 = inlined_call_operand.vmem [shape: bf16[256,100], index: 1, kind: input, shape index: {}]   ;;  %s2940_s2 = inlined_call_operand.vmem [shape: f32[1,100], index: 2, kind: input, shape index: {}]   ;;  %s2941_s3 = inlined_call_operand.vmem [shape: bf16[100,256], index: 3, kind: input, shape index: {}]   ;;  %s2942_s4 = inlined_call_operand.vmem [shape: f32[1,256], index: 4, kind: input, shape index: {}]   ;;  %s2943_s5 = inlined_call_operand.hbm [shape: f32[512,256], index: 5, kind: output, shape index: {}]  }
   0x1   :  { %12 = vsyncpa [#allocation3 + $0x1], 0 }
   0x2   :  { %13 = vsyncpa [#allocation4], 0 }
   0x3   :  { %15 = vsyncpa [#allocation4 + $0x1], 0  ;;  %s2412_s18 = smov 0   ;;  %s2414_s19 = smov 0  }
   0x4   :  { %s2416_s20 = smov 0   ;;  %s2418_s21 = smov 0  }
   0x5 LB: > { %s2433_s22 = sadd.s32 4294967295, %s2373_s21   ;;  %s1626_s23 = sadd.s32 4294967294, %s2373_s21   ;;  %s2373_s21 = sphi %s2418_s21, %s2956_s21   ;;  %s2369_s20 = sphi %s2416_s20, %s2955_s20   ;;  %s2365_s19 = sphi %s2414_s19, %s2954_s19   ;;  %s2361_s18 = sphi %s2412_s18, %s2953_s18  }
   0x6   : > { %s2437_s24 = sadd.s32 1, %s2373_s21   ;;  %s28_s25 = sadd.s32 1, %s2369_s20 }
   0x7   : > { %s25_s26 = ssub.s32 %s2373_s21, %s2437_s24  ;;  %p35_p0 = scmp.ne.s32.totalorder %s2369_s20, %s2365_s19 }
   0x8   : > { %p26_p1 = scmp.eq.s32.totalorder %s25_s26, 0  ;;  %p36_p2 = scmp.eq.s32.totalorder %s2373_s21, 0 }
   0x9   : > { %p41_p3 = scmp.ne.s32.totalorder %s2365_s19, %s2361_s18  ;;  %p42_p4 = scmp.eq.s32.totalorder %s2433_s22, 0 }
   0xa   : > { %s2449_s27 = scalar_select %p26_p1, %s2369_s20, %s28_s25  }
   0xb   : > { %p2451_p5 = por %p36_p2, %p35_p0  ;;  %p2455_p6 = por %p42_p4, %p41_p3 }
   0xc   : > { %p149_p7 = scmp.eq.s32.totalorder %s2433_s22, 1  ;;  %p155_p8 = scmp.eq.s32.totalorder %s1626_s23, 1 }
   0xd   : > { %p1818_p10 = scmp.lt.s32.totalorder %s2373_s21, 2  ;;  %s187_s7 = sand.u32 1, %s2369_s20  }
   0xe   : > { %p2462_p11 = por %p149_p7, %p35_p0  ;;  %p2466_p12 = por %p155_p8, %p41_p3 }
   0xf   : > { %s1691_s8 = sshll.u32 %s2373_s21, 13  ;;  %s1629_s9 = sshll.u32 %s187_s7, 9 }
  0x10   : > { %s2947_s30 = scalar_select %p2462_p11, 1, 0 }
  0x11   : > { %s2948_s6 = scalar_select %p2466_p12, 1, 0 }
  0x12   : > { %s2475_s12 = scalar_lea.hbm %s2938_s0, %s1691_s8  ;;  %s191_s13 = scalar_lea.vmem [#allocation2], %s1629_s9 }
  0x13   : > { %s199_s14 = sshll.u32 %s191_s13, 4  ;;  %p2479_p13 = pnand %p1818_p10, %p2451_p5  ;;  %s2483_s14 = int_to_ptr.vmem [resolvable:$true] %s199_s14 }
  0x14   : > { %s2485_s16 = scalar_lea.sflag [#allocation3], %s187_s7  ;;  %s2277_s17 = scalar_lea.hbm %s2475_s12, 8192 }
  0x15   : > { %p2278_p0 = scmp.ne.s32.totalorder %s2475_s12, %s2277_s17  ;;  %p2279_p1 = pneg %p2479_p13 }
  0x16   : > { %s2282_s26 = scalar_lea.hbm %s2938_s0, 16384  ;;  %p2283_p4 = scmp.lt.u32.totalorder %s2475_s12, %s2938_s0 }
  0x17   : > { %p2280_p2 = pnand %p2279_p1, %p2278_p0  ;;  %p2284_p5 = scmp.lt.u32.totalorder %s2282_s26, %s2277_s17 }
  0x18   : > { %p2286_p8 = scmp.lt.u32.totalorder %s2277_s17, %s2475_s12 }
  0x19   : > { %p2281_p3 = pneg %p2280_p2  ;;  %p2285_p7 = por %p2284_p5, %p2283_p4 }
  0x1b   : > { %p2287_p10 = por %p2286_p8, %p2285_p7 }
  0x1d   : > { %p2288_p9 = pnand %p2287_p10, %p2281_p3 }
  0x1f   : > { %2291 = shalt.err (!%p2288_p9)
}
  0x20   : > { %s2292_s7 = scalar_lea.vmem %s2483_s14, 8192  ;;  %s2375_s9 = smov [#allocation2]  }
  0x21   : > { %p2293_p0 = scmp.ne.s32.totalorder %s2483_s14, %s2292_s7  ;;  %s2297_s10 = sshll.u32 %s2375_s9, 4  ;;  %s2298_s10 = int_to_ptr.vmem [resolvable:$false] %s2297_s10 }
  0x22   : > { %s2299_s11 = scalar_lea.vmem %s2298_s10, 16384  ;;  %p2300_p11 = scmp.lt.s32.totalorder %s2483_s14, %s2298_s10 }
  0x23   : > { %p2295_p2 = pnand %p2293_p0, %p2279_p1  ;;  %p2301_p4 = scmp.lt.s32.totalorder %s2299_s11, %s2292_s7 }
  0x25   : > { %p2296_p12 = pneg %p2295_p2  ;;  %p2302_p5 = por %p2301_p4, %p2300_p11 }
  0x27   : > { %p2303_p7 = pnand %p2302_p5, %p2296_p12 }
  0x29   : > { %2306 = shalt.err (!%p2303_p7)
}
  0x2a   : > { %s2376_s13 = smov 256   ;;  %s2377_s17 = smov 16  }
  0x2b   : > { %1813 = dma.hbm_to_vmem [thread:$0]  (!%p2479_p13), %s2475_s12, 8192, %s2483_s14, %s2485_s16, %s2376_s13, %s2376_s13, %s2377_s17  }
  0x2c   : > { %p1633_p9 = scmp.ge.s32.totalorder %s2373_s21, 1  ;;  %p207_p1 = scmp.lt.s32.totalorder %s2373_s21, 3 }
  0x2e   : > { %p208_p3 = pnand %p1633_p9, %p207_p1 }
  0x2f   : > { %s2516_s23 = sand.u32 (!%p208_p3), 1, %s2365_s19  }
  0x30   : > { %211 = sbr.rel (%p208_p3) target bundleno = 724 (0x2d4), region = 40  ;;  %s1634_s25 = sshll.u32 (!%p208_p3), %s2516_s23, 9 }
  0x31   : > { %s214_s26 = scalar_lea.sflag (!%p208_p3), [#allocation3], %s2516_s23  ;;  %s2522_s28 = scalar_lea.vmem (!%p208_p3), [#allocation2], %s1634_s25 }
  0x37   : > { %2352 = dma.done.wait (%p2455_p6), %s214_s26, 8192  }
  0x38   : > { %2354 = vsyncadd (%p2455_p6), %s214_s26, 4294959104  ;;  %v1857_v0 = vld [vmem:[%s2939_s1 + $0x40] sm:$0xff]   ;;  %v1859_v2 = vld [vmem:[%s2939_s1 + $0x48] sm:$0xff]   ;;  %vm954_vm0 = vcmask 1041408   ;;  %vm905_vm1 = vcmask 818176   ;;  %s2773_s11 = scalar_lea.vmem [#allocation5], %s1634_s25 }
  0x39   : > { %v1858_v1 = vld [vmem:[%s2939_s1] sm:$0xff]   ;;  %1694 = vmatprep.subr.bf16.mxu0 %v1857_v0  ;;  %v1860_v3 = vld [vmem:[%s2939_s1 + $0x8] sm:$0xff]   ;;  %v1861_v4 = vld [vmem:[%s2939_s1 + $0x50] sm:$0xff]   ;;  %s1693_s25 = sshll.u32 %s2433_s22, 13  ;;  %s1553_s13 = sshll.u32 %s2773_s11, 4  ;;  %s2892_s13 = int_to_ptr.vmem [resolvable:$true] %s1553_s13 }
  0x3a   : > { %1695 = vmatpush3.bf16.msra.mxu0 %v1858_v1  ;;  %v1862_v5 = vld [vmem:[%s2939_s1 + $0x10] sm:$0xff]   ;;  %v1863_v6 = vld [vmem:[%s2939_s1 + $0x58] sm:$0xff]   ;;  %v1865_v8 = vld [vmem:[%s2939_s1 + $0x60] sm:$0xff]   ;;  %s2890_s12 = scalar_lea.hbm %s2943_s5, %s1693_s25  ;;  %s1539_s14 = scalar_lea.sflag [#allocation4], %s2516_s23 }
  0x3b   : > { %1696 = vmatprep.subr.bf16.mxu0 %v1859_v2  ;;  %v1864_v7 = vld [vmem:[%s2939_s1 + $0x18] sm:$0xff]   ;;  %v1866_v9 = vld [vmem:[%s2939_s1 + $0x20] sm:$0xff]   ;;  %v1867_v10 = vld [vmem:[%s2939_s1 + $0x68] sm:$0xff]   ;;  %s2307_s15 = scalar_lea.vmem %s2892_s13, 8192  ;;  %p2950_p11 = scmp.ne.s32.totalorder %s2947_s30, 0 }
  0x3c   : > { %v248_v11 = vld [vmem:[%s2522_s28 + $0x8] sm:$0xff]  ;;  %v250_v12 = vld [vmem:[%s2522_s28 + $0x18] sm:$0xff]  ;;  %v1869_v15 = vld [vmem:[%s2939_s1 + $0x70] sm:$0xff]   ;;  %p2308_p6 = scmp.ne.s32.totalorder %s2892_s13, %s2307_s15  ;;  %s2379_s22 = smov [#allocation5]  }
  0x3d   : > { %v312_v13 = vpack.c.bf16 %v250_v12, %v248_v11  ;;  %v1868_v14 = vld [vmem:[%s2939_s1 + $0x28] sm:$0xff]   ;;  %v1870_v16 = vld [vmem:[%s2939_s1 + $0x30] sm:$0xff]   ;;  %v1871_v17 = vld [vmem:[%s2939_s1 + $0x78] sm:$0xff]   ;;  %s2311_s16 = sshll.u32 %s2379_s22, 4  ;;  %s2312_s16 = int_to_ptr.vmem [resolvable:$false] %s2311_s16 }
  0x3e   : > { %1697 = vmatpush3.bf16.msra.mxu0 %v1860_v3  ;;  %v1872_v18 = vld [vmem:[%s2939_s1 + $0x38] sm:$0xff]   ;;  %v247_v19 = vld [vmem:[%s2522_s28] sm:$0xff]  ;;  %v249_v20 = vld [vmem:[%s2522_s28 + $0x10] sm:$0xff]  ;;  %p2309_p12 = pnand %p2308_p6, %p2950_p11  ;;  %s2313_s8 = scalar_lea.vmem %s2312_s16, 16384 }
  0x3f   : > { %1698 = vmatprep.subr.bf16.mxu0 %v1861_v4  ;;  %510 = vmatprep.mubr.bf16.mxu0 %v312_v13  ;;  %v252_v21 = vld [vmem:[%s2522_s28 + $0x28] sm:$0xff]  ;;  %v254_v22 = vld [vmem:[%s2522_s28 + $0x38] sm:$0xff]  ;;  %v311_v23 = vpack.c.bf16 %v249_v20, %v247_v19  ;;  %v251_v25 = vld [vmem:[%s2522_s28 + $0x20] sm:$0xff]  ;;  %p2314_p8 = scmp.lt.s32.totalorder %s2892_s13, %s2312_s16  ;;  %p2315_p10 = scmp.lt.s32.totalorder %s2313_s8, %s2307_s15 }
  0x40   : > { %v314_v24 = vpack.c.bf16 %v254_v22, %v252_v21  ;;  %v253_v26 = vld [vmem:[%s2522_s28 + $0x30] sm:$0xff]  ;;  %v256_v27 = vld [vmem:[%s2522_s28 + $0x48] sm:$0xff]  ;;  %v258_v28 = vld [vmem:[%s2522_s28 + $0x58] sm:$0xff]  ;;  %p2310_p13 = pneg %p2309_p12 }
  0x41   : > { %v313_v29 = vpack.c.bf16 %v253_v26, %v251_v25  ;;  %v316_v30 = vpack.c.bf16 %v258_v28, %v256_v27  ;;  %v255_v31 = vld [vmem:[%s2522_s28 + $0x40] sm:$0xff]  ;;  %v257_v32 = vld [vmem:[%s2522_s28 + $0x50] sm:$0xff]  ;;  %v260_v33 = vld [vmem:[%s2522_s28 + $0x68] sm:$0xff]  ;;  %p2316_p0 = por %p2315_p10, %p2314_p8 }
  0x42   : > { %1699 = vmatpush3.bf16.msra.mxu0 %v1862_v5  ;;  %v262_v34 = vld [vmem:[%s2522_s28 + $0x78] sm:$0xff]  ;;  %v315_v35 = vpack.c.bf16 %v257_v32, %v255_v31  ;;  %v259_v37 = vld [vmem:[%s2522_s28 + $0x60] sm:$0xff]  ;;  %v261_v38 = vld [vmem:[%s2522_s28 + $0x70] sm:$0xff] }
  0x43   : > { %1700 = vmatprep.subr.bf16.mxu0 %v1863_v6  ;;  %v318_v36 = vpack.c.bf16 %v262_v34, %v260_v33  ;;  %v264_v39 = vld [vmem:[%s2522_s28 + $0x88] sm:$0xff]  ;;  %v266_v40 = vld [vmem:[%s2522_s28 + $0x98] sm:$0xff]  ;;  %v317_v41 = vpack.c.bf16 %v261_v38, %v259_v37  ;;  %v263_v43 = vld [vmem:[%s2522_s28 + $0x80] sm:$0xff]  ;;  %p2317_p2 = pnand %p2316_p0, %p2310_p13 }
  0x44   : > { %v320_v42 = vpack.c.bf16 %v266_v40, %v264_v39  ;;  %v265_v44 = vld [vmem:[%s2522_s28 + $0x90] sm:$0xff]  ;;  %v268_v45 = vld [vmem:[%s2522_s28 + $0xa8] sm:$0xff]  ;;  %v270_v46 = vld [vmem:[%s2522_s28 + $0xb8] sm:$0xff] }
  0x45   : > { %v319_v47 = vpack.c.bf16 %v265_v44, %v263_v43  ;;  %v322_v48 = vpack.c.bf16 %v270_v46, %v268_v45  ;;  %v267_v49 = vld [vmem:[%s2522_s28 + $0xa0] sm:$0xff]  ;;  %v269_v50 = vld [vmem:[%s2522_s28 + $0xb0] sm:$0xff]  ;;  %v272_v51 = vld [vmem:[%s2522_s28 + $0xc8] sm:$0xff] }
  0x46   : > { %1701 = vmatpush3.bf16.msra.mxu0 %v1864_v7  ;;  %v274_v52 = vld [vmem:[%s2522_s28 + $0xd8] sm:$0xff]  ;;  %v321_v53 = vpack.c.bf16 %v269_v50, %v267_v49  ;;  %v271_v55 = vld [vmem:[%s2522_s28 + $0xc0] sm:$0xff]  ;;  %v273_v56 = vld [vmem:[%s2522_s28 + $0xd0] sm:$0xff] }
  0x47   : > { %1702 = vmatprep.subr.bf16.mxu0 %v1865_v8  ;;  %v324_v54 = vpack.c.bf16 %v274_v52, %v272_v51  ;;  %v276_v57 = vld [vmem:[%s2522_s28 + $0xe8] sm:$0xff]  ;;  %v278_v58 = vld [vmem:[%s2522_s28 + $0xf8] sm:$0xff]  ;;  %v323_v59 = vpack.c.bf16 %v273_v56, %v271_v55  ;;  %v275_v61 = vld [vmem:[%s2522_s28 + $0xe0] sm:$0xff] }
  0x48   : > { %v326_v60 = vpack.c.bf16 %v278_v58, %v276_v57  ;;  %v277_v62 = vld [vmem:[%s2522_s28 + $0xf0] sm:$0xff]  ;;  %v280_v63 = vld [vmem:[%s2522_s28 + $0x108] sm:$0xff]  ;;  %v282_v0 = vld [vmem:[%s2522_s28 + $0x118] sm:$0xff] }
  0x49   : > { %v325_v1 = vpack.c.bf16 %v277_v62, %v275_v61  ;;  %v328_v2 = vpack.c.bf16 %v282_v0, %v280_v63  ;;  %v279_v3 = vld [vmem:[%s2522_s28 + $0x100] sm:$0xff]  ;;  %v281_v4 = vld [vmem:[%s2522_s28 + $0x110] sm:$0xff]  ;;  %v284_v5 = vld [vmem:[%s2522_s28 + $0x128] sm:$0xff]  ;;  %v2378_v0 = vmov 0  }
  0x4a   : > { %1703 = vmatpush3.bf16.msra.mxu0 %v1866_v9  ;;  %v286_v6 = vld [vmem:[%s2522_s28 + $0x138] sm:$0xff]  ;;  %v327_v7 = vpack.c.bf16 %v281_v4, %v279_v3  ;;  %v283_v9 = vld [vmem:[%s2522_s28 + $0x120] sm:$0xff]  ;;  %v288_v11 = vld [vmem:[%s2522_s28 + $0x148] sm:$0xff]  ;;  %993 = vmatprep.mubr.bf16.mxu1 %v2378_v0 }
  0x4b   : > { %1704 = vmatprep.subr.bf16.mxu0 %v1867_v10  ;;  %v330_v8 = vpack.c.bf16 %v286_v6, %v284_v5  ;;  %v285_v10 = vld [vmem:[%s2522_s28 + $0x130] sm:$0xff]  ;;  %v290_v12 = vld [vmem:[%s2522_s28 + $0x158] sm:$0xff]  ;;  %v291_v21 = vld [vmem:[%s2522_s28 + $0x160] sm:$0xff] }
  0x4c   : > { %v329_v13 = vpack.c.bf16 %v285_v10, %v283_v9  ;;  %v293_v22 = vld [vmem:[%s2522_s28 + $0x170] sm:$0xff]  ;;  %v295_v27 = vld [vmem:[%s2522_s28 + $0x180] sm:$0xff]  ;;  %v304_v39 = vld [vmem:[%s2522_s28 + $0x1c8] sm:$0xff] }
  0x4d   : > { %v333_v25 = vpack.c.bf16 %v293_v22, %v291_v21  ;;  %v297_v28 = vld [vmem:[%s2522_s28 + $0x190] sm:$0xff]  ;;  %v1873_v31 = vld [vmem:[%s2941_s3 + $0x4] ss:$8 sps:$4 sm:$0xff]   ;;  %v1875_v33 = vld [vmem:[%s2941_s3] ss:$8 sps:$4 sm:$0xff]  }
  0x4e   : > { %1705 = vmatpush3.bf16.msra.mxu0 %v1868_v14  ;;  %v332_v14 = vpack.c.bf16 %v290_v12, %v288_v11  ;;  %v335_v32 = vpack.c.bf16 %v297_v28, %v295_v27  ;;  %961 = vmatprep.subr.bf16.mxu1 %v1873_v31  ;;  %v299_v37 = vld [vmem:[%s2522_s28 + $0x1a0] sm:$0xff]  ;;  %v301_v38 = vld [vmem:[%s2522_s28 + $0x1b0] sm:$0xff]  ;;  %v306_v40 = vld [vmem:[%s2522_s28 + $0x1d8] sm:$0xff] }
  0x4f   : > { %1706 = vmatprep.subr.bf16.mxu0 %v1869_v15  ;;  %v287_v15 = vld [vmem:[%s2522_s28 + $0x140] sm:$0xff]  ;;  %962 = vmatpush1.bf16.msra.mxu1 %v1875_v33  ;;  %v340_v44 = vpack.c.bf16 %v306_v40, %v304_v39  ;;  %v1882_v45 = vld [vmem:[%s2941_s3 + $0x34] ss:$8 sps:$4 sm:$0xff]   ;;  %v1884_v46 = vld [vmem:[%s2941_s3 + $0x30] ss:$8 sps:$4 sm:$0xff]  }
  0x50   : > { %v1881_v43 = vld [vmem:[%s2941_s3 + $0x20] ss:$8 sps:$4 sm:$0xff]   ;;  %v310_v50 = vld [vmem:[%s2522_s28 + $0x1f8] sm:$0xff]  ;;  %v1885_v51 = vld [vmem:[%s2941_s3 + $0x44] ss:$8 sps:$4 sm:$0xff]  }
  0x51   : > { %v308_v49 = vld [vmem:[%s2522_s28 + $0x1e8] sm:$0xff]  ;;  %v1888_v55 = vld [vmem:[%s2941_s3 + $0x54] ss:$8 sps:$4 sm:$0xff]   ;;  %v1890_v56 = vld [vmem:[%s2941_s3 + $0x50] ss:$8 sps:$4 sm:$0xff]  }
  0x52   : > { %1707 = vmatpush3.bf16.msra.mxu0 %v1870_v16  ;;  %v289_v16 = vld [vmem:[%s2522_s28 + $0x150] sm:$0xff]  ;;  %v307_v57 = vld [vmem:[%s2522_s28 + $0x1e0] sm:$0xff] }
  0x53   : > { %1708 = vmatprep.subr.bf16.mxu0 %v1871_v17  ;;  %v292_v17 = vld [vmem:[%s2522_s28 + $0x168] sm:$0xff]  ;;  %v331_v19 = vpack.c.bf16 %v289_v16, %v287_v15  ;;  %v309_v58 = vld [vmem:[%s2522_s28 + $0x1f0] sm:$0xff] }
  0x54   : > { %v341_v62 = vpack.c.bf16 %v309_v58, %v307_v57 }
  0x56   : > { %1709 = vmatpush3.bf16.msra.mxu0 %v1872_v18  ;;  %v294_v18 = vld [vmem:[%s2522_s28 + $0x178] sm:$0xff] }
  0x57   : > { %v334_v20 = vpack.c.bf16 %v294_v18, %v292_v17 }
  0x59   : > { %511 = vmatmul.mubr.bf16.vlgmr.msra.gmra.mrb[0].mxu0 %v311_v23  ;;  %v296_v23 = vld [vmem:[%s2522_s28 + $0x188] sm:$0xff] }
  0x5a   : > { %518 = vmatprep.mubr.bf16.mxu0 %v314_v24  ;;  %v298_v24 = vld [vmem:[%s2522_s28 + $0x198] sm:$0xff] }
  0x5b   : > { %v336_v26 = vpack.c.bf16 %v298_v24, %v296_v23 }
  0x61   : > { %519 = vmatmul.mubr.bf16.gmra.mrb[4].mxu0 %v313_v29  ;;  %v300_v29 = vld [vmem:[%s2522_s28 + $0x1a8] sm:$0xff] }
  0x62   : > { %526 = vmatprep.mubr.bf16.mxu0 %v316_v30  ;;  %v302_v30 = vld [vmem:[%s2522_s28 + $0x1b8] sm:$0xff] }
  0x63   : > { %v338_v34 = vpack.c.bf16 %v302_v30, %v300_v29 }
  0x69   : > { %527 = vmatmul.mubr.bf16.gmra.mrb[8].mxu0 %v315_v35  ;;  %v1876_v35 = vld [vmem:[%s2941_s3 + $0x14] ss:$8 sps:$4 sm:$0xff]  }
  0x6a   : > { %534 = vmatprep.mubr.bf16.mxu0 %v318_v36  ;;  %v1878_v36 = vld [vmem:[%s2941_s3 + $0x10] ss:$8 sps:$4 sm:$0xff]   ;;  %963 = vmatprep.subr.bf16.mxu1 %v1876_v35 }
  0x6b   : > { %964 = vmatpush1.bf16.msra.mxu1 %v1878_v36 }
  0x71   : > { %535 = vmatmul.mubr.bf16.gmra.mrb[12].mxu0 %v317_v41  ;;  %v1879_v41 = vld [vmem:[%s2941_s3 + $0x24] ss:$8 sps:$4 sm:$0xff]  }
  0x72   : > { %542 = vmatprep.mubr.bf16.mxu0 %v320_v42  ;;  %v337_v42 = vpack.c.bf16 %v301_v38, %v299_v37  ;;  %965 = vmatprep.subr.bf16.mxu1 %v1879_v41 }
  0x73   : > { %966 = vmatpush1.bf16.msra.mxu1 %v1881_v43 }
  0x74   : > { %967 = vmatprep.subr.bf16.mxu1 %v1882_v45 }
  0x77   : > { %968 = vmatpush1.bf16.msra.mxu1 %v1884_v46 }
  0x78   : > { %969 = vmatprep.subr.bf16.mxu1 %v1885_v51 }
  0x79   : > { %543 = vmatmul.mubr.bf16.gmra.mrb[16].mxu0 %v319_v47  ;;  %v303_v47 = vld [vmem:[%s2522_s28 + $0x1c0] sm:$0xff] }
  0x7a   : > { %550 = vmatprep.mubr.bf16.mxu0 %v322_v48  ;;  %v305_v48 = vld [vmem:[%s2522_s28 + $0x1d0] sm:$0xff] }
  0x7b   : > { %v339_v52 = vpack.c.bf16 %v305_v48, %v303_v47 }
  0x81   : > { %551 = vmatmul.mubr.bf16.gmra.mrb[20].mxu0 %v321_v53  ;;  %v1887_v53 = vld [vmem:[%s2941_s3 + $0x40] ss:$8 sps:$4 sm:$0xff]  }
  0x82   : > { %558 = vmatprep.mubr.bf16.mxu0 %v324_v54  ;;  %v342_v54 = vpack.c.bf16 %v310_v50, %v308_v49  ;;  %970 = vmatpush1.bf16.msra.mxu1 %v1887_v53 }
  0x83   : > { %971 = vmatprep.subr.bf16.mxu1 %v1888_v55 }
  0x86   : > { %972 = vmatpush1.bf16.msra.mxu1 %v1890_v56 }
  0x89   : > { %559 = vmatmul.mubr.bf16.gmra.mrb[24].mxu0 %v323_v59  ;;  %v827_v59 = vld [vmem:[%s2941_s3 + $0x60] sm:$0x33] }
  0x8a   : > { %566 = vmatprep.mubr.bf16.mxu0 %v326_v60  ;;  %v1666_v60 = vcombine.high %v827_v59, %v827_v59  ;;  %v1665_v61 = vcombine.low %v827_v59, %v827_v59 }
  0x8c   : > { %1667 = vmatprep.subr.msk.bf16.mxu1 %vm954_vm0, %v1666_v60  ;;  %v956_v63 = vsel %vm954_vm0, %v1665_v61, 0 }
  0x8d   : > { %974 = vmatpush1.bf16.msra.mxu1 %v956_v63 }
  0x91   : > { %567 = vmatmul.mubr.bf16.gmra.mrb[28].mxu0 %v325_v1 }
  0x92   : > { %574 = vmatprep.mubr.bf16.mxu0 %v328_v2  ;;  %v2683_v2 = vld [vmem:[%s2940_s2] ss:$0 sm:$0xff] }
  0x99   : > { %575 = vmatmul.mubr.bf16.gmra.mrb[32].mxu0 %v327_v7 }
  0x9a   : > { %582 = vmatprep.mubr.bf16.mxu0 %v330_v8 }
  0xa1   : > { %583 = vmatmul.mubr.bf16.gmra.mrb[36].mxu0 %v329_v13 }
  0xa2   : > { %590 = vmatprep.mubr.bf16.mxu0 %v332_v14 }
  0xa9   : > { %591 = vmatmul.mubr.bf16.gmra.mrb[40].mxu0 %v331_v19 }
  0xaa   : > { %598 = vmatprep.mubr.bf16.mxu0 %v334_v20 }
  0xb1   : > { %599 = vmatmul.mubr.bf16.gmra.mrb[44].mxu0 %v333_v25 }
  0xb2   : > { %606 = vmatprep.mubr.bf16.mxu0 %v336_v26 }
  0xb9   : > { %607 = vmatmul.mubr.bf16.gmra.mrb[48].mxu0 %v335_v32 }
  0xba   : > { %614 = vmatprep.mubr.bf16.mxu0 %v338_v34 }
  0xc1   : > { %615 = vmatmul.mubr.bf16.gmra.mrb[52].mxu0 %v337_v42 }
  0xc2   : > { %622 = vmatprep.mubr.bf16.mxu0 %v340_v44 }
  0xc9   : > { %623 = vmatmul.mubr.bf16.gmra.mrb[56].mxu0 %v339_v52 }
  0xca   : > { %630 = vmatprep.mubr.bf16.mxu0 %v342_v54 }
  0xd1   : > { %631 = vmatmul.mubr.bf16.gmra.mrb[60].mxu0 %v341_v62 }
 0x12c   : > { %v1710_v1 = vpop.f32.mrb[0].mxu0 }
 0x12d   : > { %v1711_v3 = vpop.f32.mrb[1].mxu0 }
 0x12e   : > { %v1712_v4 = vadd.f32 %v1711_v3, %v1710_v1  ;;  %v1713_v5 = vpop.f32.mrb[2].mxu0 }
 0x12f   : > { %v1714_v6 = vpop.f32.mrb[3].mxu0 }
 0x130   : > { %v513_v7 = vadd.f32 %v1712_v4, %v2683_v2  ;;  %v1715_v8 = vadd.f32 %v1714_v6, %v1713_v5 }
 0x132   : > { %v639_v9 = vsub.f32 0.0, %v513_v7  ;;  %v516_v10 = vadd.f32 %v1715_v8, %v2683_v2 }
 0x134   : > { %v671_v11 = vmul.f32 1.442695, %v639_v9  ;;  %v640_v12 = vsub.f32 0.0, %v516_v10  ;;  %v1716_v13 = vpop.f32.mrb[4].mxu0 }
 0x135   : > { %v1717_v14 = vpop.f32.mrb[5].mxu0 }
 0x136   : > { %1893 = vpow2.f32 %v671_v11  ;;  %v673_v15 = vmul.f32 1.442695, %v640_v12  ;;  %v1718_v16 = vadd.f32 %v1717_v14, %v1716_v13  ;;  %v1719_v17 = vpop.f32.mrb[6].mxu0 }
 0x137   : > { %v1720_v18 = vpop.f32.mrb[7].mxu0 }
 0x138   : > { %1895 = vpow2.f32 %v673_v15  ;;  %v521_v19 = vadd.f32 %v1718_v16, %v2683_v2  ;;  %v1721_v20 = vadd.f32 %v1720_v18, %v1719_v17 }
 0x13a   : > { %v641_v21 = vsub.f32 0.0, %v521_v19  ;;  %v524_v22 = vadd.f32 %v1721_v20, %v2683_v2 }
 0x13c   : > { %v675_v23 = vmul.f32 1.442695, %v641_v21  ;;  %v642_v24 = vsub.f32 0.0, %v524_v22  ;;  %v1722_v25 = vpop.f32.mrb[8].mxu0 }
 0x13d   : > { %v1723_v26 = vpop.f32.mrb[9].mxu0 }
 0x13e   : > { %1897 = vpow2.f32 %v675_v23  ;;  %v677_v27 = vmul.f32 1.442695, %v642_v24  ;;  %v1724_v28 = vadd.f32 %v1723_v26, %v1722_v25  ;;  %v1725_v29 = vpop.f32.mrb[10].mxu0 }
 0x13f   : > { %v1726_v30 = vpop.f32.mrb[11].mxu0 }
 0x140   : > { %v1894_v31 = vpop.eup %1893  ;;  %1899 = vpow2.f32 %v677_v27  ;;  %v529_v32 = vadd.f32 %v1724_v28, %v2683_v2  ;;  %v1727_v33 = vadd.f32 %v1726_v30, %v1725_v29 }
 0x141   : > { %v735_v34 = vadd.f32 1.0, %v1894_v31 }
 0x142   : > { %v1896_v35 = vpop.eup %1895  ;;  %v643_v36 = vsub.f32 0.0, %v529_v32  ;;  %v532_v37 = vadd.f32 %v1727_v33, %v2683_v2 }
 0x143   : > { %v736_v38 = vadd.f32 1.0, %v1896_v35  ;;  %1901 = vrcp.f32 %v735_v34 }
 0x144   : > { %v679_v39 = vmul.f32 1.442695, %v643_v36  ;;  %v644_v40 = vsub.f32 0.0, %v532_v37  ;;  %v1728_v41 = vpop.f32.mrb[12].mxu0 }
 0x145   : > { %1903 = vrcp.f32 %v736_v38  ;;  %v1729_v42 = vpop.f32.mrb[13].mxu0 }
 0x146   : > { %1905 = vpow2.f32 %v679_v39  ;;  %v681_v43 = vmul.f32 1.442695, %v644_v40  ;;  %v1730_v44 = vadd.f32 %v1729_v42, %v1728_v41  ;;  %v1731_v45 = vpop.f32.mrb[14].mxu0 }
 0x147   : > { %v1732_v46 = vpop.f32.mrb[15].mxu0 }
 0x148   : > { %v1898_v47 = vpop.eup %1897  ;;  %1907 = vpow2.f32 %v681_v43  ;;  %v537_v48 = vadd.f32 %v1730_v44, %v2683_v2  ;;  %v1733_v49 = vadd.f32 %v1732_v46, %v1731_v45 }
 0x149   : > { %v737_v50 = vadd.f32 1.0, %v1898_v47 }
 0x14a   : > { %v1900_v51 = vpop.eup %1899  ;;  %v645_v52 = vsub.f32 0.0, %v537_v48  ;;  %v540_v53 = vadd.f32 %v1733_v49, %v2683_v2 }
 0x14b   : > { %v738_v54 = vadd.f32 1.0, %v1900_v51  ;;  %1909 = vrcp.f32 %v737_v50 }
 0x14c   : > { %v683_v55 = vmul.f32 1.442695, %v645_v52  ;;  %v646_v56 = vsub.f32 0.0, %v540_v53  ;;  %v1734_v57 = vpop.f32.mrb[16].mxu0 }
 0x14d   : > { %1911 = vrcp.f32 %v738_v54  ;;  %v1735_v58 = vpop.f32.mrb[17].mxu0  ;;  %v1902_v59 = vpop.eup %1901 }
 0x14e   : > { %1913 = vpow2.f32 %v683_v55  ;;  %v685_v60 = vmul.f32 1.442695, %v646_v56  ;;  %v1736_v61 = vadd.f32 %v1735_v58, %v1734_v57  ;;  %v1737_v62 = vpop.f32.mrb[18].mxu0 }
 0x14f   : > { %v1904_v63 = vpop.eup %1903  ;;  %v1738_v1 = vpop.f32.mrb[19].mxu0 }
 0x150   : > { %v1906_v3 = vpop.eup %1905  ;;  %1915 = vpow2.f32 %v685_v60  ;;  %v545_v4 = vadd.f32 %v1736_v61, %v2683_v2  ;;  %v1739_v5 = vadd.f32 %v1738_v1, %v1737_v62  ;;  %v799_v6 = vpack.c.bf16 %v1904_v63, %v1902_v59 }
 0x151   : > { %v739_v7 = vadd.f32 1.0, %v1906_v3 }
 0x152   : > { %v1908_v8 = vpop.eup %1907  ;;  %v647_v9 = vsub.f32 0.0, %v545_v4  ;;  %v548_v10 = vadd.f32 %v1739_v5, %v2683_v2  ;;  %1668 = vmatmul.mubr.msk.bf16.vlgmr.msra.gmra.mrb[0].mxu1 %vm905_vm1, %v799_v6 }
 0x153   : > { %v740_v11 = vadd.f32 1.0, %v1908_v8  ;;  %1003 = vmatprep.mubr.bf16.mxu1 %v2378_v0  ;;  %1917 = vrcp.f32 %v739_v7 }
 0x154   : > { %v687_v12 = vmul.f32 1.442695, %v647_v9  ;;  %v648_v13 = vsub.f32 0.0, %v548_v10  ;;  %v1740_v14 = vpop.f32.mrb[20].mxu0 }
 0x155   : > { %1919 = vrcp.f32 %v740_v11  ;;  %v1741_v15 = vpop.f32.mrb[21].mxu0  ;;  %v1910_v16 = vpop.eup %1909 }
 0x156   : > { %1921 = vpow2.f32 %v687_v12  ;;  %v689_v17 = vmul.f32 1.442695, %v648_v13  ;;  %v1742_v18 = vadd.f32 %v1741_v15, %v1740_v14  ;;  %v1743_v19 = vpop.f32.mrb[22].mxu0 }
 0x157   : > { %v1912_v20 = vpop.eup %1911  ;;  %v1744_v21 = vpop.f32.mrb[23].mxu0 }
 0x158   : > { %v1914_v22 = vpop.eup %1913  ;;  %1923 = vpow2.f32 %v689_v17  ;;  %v553_v23 = vadd.f32 %v1742_v18, %v2683_v2  ;;  %v1745_v24 = vadd.f32 %v1744_v21, %v1743_v19  ;;  %v800_v25 = vpack.c.bf16 %v1912_v20, %v1910_v16 }
 0x159   : > { %v741_v26 = vadd.f32 1.0, %v1914_v22 }
 0x15a   : > { %v1916_v27 = vpop.eup %1915  ;;  %v649_v28 = vsub.f32 0.0, %v553_v23  ;;  %v556_v29 = vadd.f32 %v1745_v24, %v2683_v2  ;;  %1669 = vmatmul.mubr.msk.bf16.gmra.mrb[4].mxu1 %vm905_vm1, %v800_v25 }
 0x15b   : > { %v742_v30 = vadd.f32 1.0, %v1916_v27  ;;  %1013 = vmatprep.mubr.bf16.mxu1 %v2378_v0  ;;  %1925 = vrcp.f32 %v741_v26 }
 0x15c   : > { %v691_v31 = vmul.f32 1.442695, %v649_v28  ;;  %v650_v32 = vsub.f32 0.0, %v556_v29  ;;  %v1746_v33 = vpop.f32.mrb[24].mxu0 }
 0x15d   : > { %1927 = vrcp.f32 %v742_v30  ;;  %v1747_v34 = vpop.f32.mrb[25].mxu0  ;;  %v1918_v35 = vpop.eup %1917 }
 0x15e   : > { %1929 = vpow2.f32 %v691_v31  ;;  %v693_v36 = vmul.f32 1.442695, %v650_v32  ;;  %v1748_v37 = vadd.f32 %v1747_v34, %v1746_v33  ;;  %v1749_v38 = vpop.f32.mrb[26].mxu0 }
 0x15f   : > { %v1920_v39 = vpop.eup %1919  ;;  %v1750_v40 = vpop.f32.mrb[27].mxu0 }
 0x160   : > { %v1922_v41 = vpop.eup %1921  ;;  %1931 = vpow2.f32 %v693_v36  ;;  %v561_v42 = vadd.f32 %v1748_v37, %v2683_v2  ;;  %v1751_v43 = vadd.f32 %v1750_v40, %v1749_v38  ;;  %v801_v44 = vpack.c.bf16 %v1920_v39, %v1918_v35 }
 0x161   : > { %v743_v45 = vadd.f32 1.0, %v1922_v41 }
 0x162   : > { %v1924_v46 = vpop.eup %1923  ;;  %v651_v47 = vsub.f32 0.0, %v561_v42  ;;  %v564_v48 = vadd.f32 %v1751_v43, %v2683_v2  ;;  %1670 = vmatmul.mubr.msk.bf16.gmra.mrb[8].mxu1 %vm905_vm1, %v801_v44 }
 0x163   : > { %v744_v49 = vadd.f32 1.0, %v1924_v46  ;;  %1023 = vmatprep.mubr.bf16.mxu1 %v2378_v0  ;;  %1933 = vrcp.f32 %v743_v45 }
 0x164   : > { %v695_v50 = vmul.f32 1.442695, %v651_v47  ;;  %v652_v51 = vsub.f32 0.0, %v564_v48  ;;  %v1752_v52 = vpop.f32.mrb[28].mxu0 }
 0x165   : > { %1935 = vrcp.f32 %v744_v49  ;;  %v1753_v53 = vpop.f32.mrb[29].mxu0  ;;  %v1926_v54 = vpop.eup %1925 }
 0x166   : > { %1937 = vpow2.f32 %v695_v50  ;;  %v697_v55 = vmul.f32 1.442695, %v652_v51  ;;  %v1754_v56 = vadd.f32 %v1753_v53, %v1752_v52  ;;  %v1755_v57 = vpop.f32.mrb[30].mxu0 }
 0x167   : > { %v1928_v58 = vpop.eup %1927  ;;  %v1756_v59 = vpop.f32.mrb[31].mxu0 }
 0x168   : > { %v1930_v60 = vpop.eup %1929  ;;  %1939 = vpow2.f32 %v697_v55  ;;  %v569_v61 = vadd.f32 %v1754_v56, %v2683_v2  ;;  %v1757_v62 = vadd.f32 %v1756_v59, %v1755_v57  ;;  %v802_v63 = vpack.c.bf16 %v1928_v58, %v1926_v54 }
 0x169   : > { %v745_v1 = vadd.f32 1.0, %v1930_v60 }
 0x16a   : > { %v1932_v3 = vpop.eup %1931  ;;  %v653_v4 = vsub.f32 0.0, %v569_v61  ;;  %v572_v5 = vadd.f32 %v1757_v62, %v2683_v2  ;;  %1671 = vmatmul.mubr.msk.bf16.gmra.mrb[12].mxu1 %vm905_vm1, %v802_v63 }
 0x16b   : > { %v746_v6 = vadd.f32 1.0, %v1932_v3  ;;  %1033 = vmatprep.mubr.bf16.mxu1 %v2378_v0  ;;  %1941 = vrcp.f32 %v745_v1 }
 0x16c   : > { %v699_v7 = vmul.f32 1.442695, %v653_v4  ;;  %v654_v8 = vsub.f32 0.0, %v572_v5  ;;  %v1758_v9 = vpop.f32.mrb[32].mxu0 }
 0x16d   : > { %1943 = vrcp.f32 %v746_v6  ;;  %v1759_v10 = vpop.f32.mrb[33].mxu0  ;;  %v1934_v11 = vpop.eup %1933 }
 0x16e   : > { %1945 = vpow2.f32 %v699_v7  ;;  %v701_v12 = vmul.f32 1.442695, %v654_v8  ;;  %v1760_v13 = vadd.f32 %v1759_v10, %v1758_v9  ;;  %v1761_v14 = vpop.f32.mrb[34].mxu0 }
 0x16f   : > { %v1936_v15 = vpop.eup %1935  ;;  %v1762_v16 = vpop.f32.mrb[35].mxu0 }
 0x170   : > { %v1938_v17 = vpop.eup %1937  ;;  %1947 = vpow2.f32 %v701_v12  ;;  %v577_v18 = vadd.f32 %v1760_v13, %v2683_v2  ;;  %v1763_v19 = vadd.f32 %v1762_v16, %v1761_v14  ;;  %v803_v20 = vpack.c.bf16 %v1936_v15, %v1934_v11 }
 0x171   : > { %v747_v21 = vadd.f32 1.0, %v1938_v17 }
 0x172   : > { %v1940_v22 = vpop.eup %1939  ;;  %v655_v23 = vsub.f32 0.0, %v577_v18  ;;  %v580_v24 = vadd.f32 %v1763_v19, %v2683_v2  ;;  %1672 = vmatmul.mubr.msk.bf16.gmra.mrb[16].mxu1 %vm905_vm1, %v803_v20 }
 0x173   : > { %v748_v25 = vadd.f32 1.0, %v1940_v22  ;;  %1043 = vmatprep.mubr.bf16.mxu1 %v2378_v0  ;;  %1949 = vrcp.f32 %v747_v21 }
 0x174   : > { %v703_v26 = vmul.f32 1.442695, %v655_v23  ;;  %v656_v27 = vsub.f32 0.0, %v580_v24  ;;  %v1764_v28 = vpop.f32.mrb[36].mxu0 }
 0x175   : > { %1951 = vrcp.f32 %v748_v25  ;;  %v1765_v29 = vpop.f32.mrb[37].mxu0  ;;  %v1942_v30 = vpop.eup %1941 }
 0x176   : > { %1953 = vpow2.f32 %v703_v26  ;;  %v705_v31 = vmul.f32 1.442695, %v656_v27  ;;  %v1766_v32 = vadd.f32 %v1765_v29, %v1764_v28  ;;  %v1767_v33 = vpop.f32.mrb[38].mxu0 }
 0x177   : > { %v1944_v34 = vpop.eup %1943  ;;  %v1768_v35 = vpop.f32.mrb[39].mxu0 }
 0x178   : > { %v1946_v36 = vpop.eup %1945  ;;  %1955 = vpow2.f32 %v705_v31  ;;  %v585_v37 = vadd.f32 %v1766_v32, %v2683_v2  ;;  %v1769_v38 = vadd.f32 %v1768_v35, %v1767_v33  ;;  %v804_v39 = vpack.c.bf16 %v1944_v34, %v1942_v30 }
 0x179   : > { %v749_v40 = vadd.f32 1.0, %v1946_v36 }
 0x17a   : > { %v1948_v41 = vpop.eup %1947  ;;  %v657_v42 = vsub.f32 0.0, %v585_v37  ;;  %v588_v43 = vadd.f32 %v1769_v38, %v2683_v2  ;;  %1673 = vmatmul.mubr.msk.bf16.gmra.mrb[20].mxu1 %vm905_vm1, %v804_v39 }
 0x17b   : > { %v750_v44 = vadd.f32 1.0, %v1948_v41  ;;  %1053 = vmatprep.mubr.bf16.mxu1 %v2378_v0  ;;  %1957 = vrcp.f32 %v749_v40 }
 0x17c   : > { %v707_v45 = vmul.f32 1.442695, %v657_v42  ;;  %v658_v46 = vsub.f32 0.0, %v588_v43  ;;  %v1770_v47 = vpop.f32.mrb[40].mxu0 }
 0x17d   : > { %1959 = vrcp.f32 %v750_v44  ;;  %v1771_v48 = vpop.f32.mrb[41].mxu0  ;;  %v1950_v49 = vpop.eup %1949 }
 0x17e   : > { %1961 = vpow2.f32 %v707_v45  ;;  %v709_v50 = vmul.f32 1.442695, %v658_v46  ;;  %v1772_v51 = vadd.f32 %v1771_v48, %v1770_v47  ;;  %v1773_v52 = vpop.f32.mrb[42].mxu0 }
 0x17f   : > { %v1952_v53 = vpop.eup %1951  ;;  %v1774_v54 = vpop.f32.mrb[43].mxu0 }
 0x180   : > { %v1954_v55 = vpop.eup %1953  ;;  %1963 = vpow2.f32 %v709_v50  ;;  %v593_v56 = vadd.f32 %v1772_v51, %v2683_v2  ;;  %v1775_v57 = vadd.f32 %v1774_v54, %v1773_v52  ;;  %v805_v58 = vpack.c.bf16 %v1952_v53, %v1950_v49 }
 0x181   : > { %v751_v59 = vadd.f32 1.0, %v1954_v55 }
 0x182   : > { %v1956_v60 = vpop.eup %1955  ;;  %v659_v61 = vsub.f32 0.0, %v593_v56  ;;  %v596_v62 = vadd.f32 %v1775_v57, %v2683_v2  ;;  %1674 = vmatmul.mubr.msk.bf16.gmra.mrb[24].mxu1 %vm905_vm1, %v805_v58 }
 0x183   : > { %v752_v63 = vadd.f32 1.0, %v1956_v60  ;;  %1063 = vmatprep.mubr.bf16.mxu1 %v2378_v0  ;;  %1965 = vrcp.f32 %v751_v59 }
 0x184   : > { %v711_v1 = vmul.f32 1.442695, %v659_v61  ;;  %v660_v3 = vsub.f32 0.0, %v596_v62  ;;  %v1776_v4 = vpop.f32.mrb[44].mxu0 }
 0x185   : > { %1967 = vrcp.f32 %v752_v63  ;;  %v1777_v5 = vpop.f32.mrb[45].mxu0  ;;  %v1958_v6 = vpop.eup %1957 }
 0x186   : > { %1969 = vpow2.f32 %v711_v1  ;;  %v713_v7 = vmul.f32 1.442695, %v660_v3  ;;  %v1778_v8 = vadd.f32 %v1777_v5, %v1776_v4  ;;  %v1779_v9 = vpop.f32.mrb[46].mxu0 }
 0x187   : > { %v1960_v10 = vpop.eup %1959  ;;  %v1780_v11 = vpop.f32.mrb[47].mxu0 }
 0x188   : > { %v1962_v12 = vpop.eup %1961  ;;  %1971 = vpow2.f32 %v713_v7  ;;  %v601_v13 = vadd.f32 %v1778_v8, %v2683_v2  ;;  %v1781_v14 = vadd.f32 %v1780_v11, %v1779_v9  ;;  %v806_v15 = vpack.c.bf16 %v1960_v10, %v1958_v6 }
 0x189   : > { %v753_v16 = vadd.f32 1.0, %v1962_v12 }
 0x18a   : > { %v1964_v17 = vpop.eup %1963  ;;  %v661_v18 = vsub.f32 0.0, %v601_v13  ;;  %v604_v19 = vadd.f32 %v1781_v14, %v2683_v2  ;;  %1675 = vmatmul.mubr.msk.bf16.gmra.mrb[28].mxu1 %vm905_vm1, %v806_v15 }
 0x18b   : > { %v754_v20 = vadd.f32 1.0, %v1964_v17  ;;  %1073 = vmatprep.mubr.bf16.mxu1 %v2378_v0  ;;  %1973 = vrcp.f32 %v753_v16 }
 0x18c   : > { %v715_v21 = vmul.f32 1.442695, %v661_v18  ;;  %v662_v22 = vsub.f32 0.0, %v604_v19  ;;  %v1782_v23 = vpop.f32.mrb[48].mxu0 }
 0x18d   : > { %1975 = vrcp.f32 %v754_v20  ;;  %v1783_v24 = vpop.f32.mrb[49].mxu0  ;;  %v1966_v25 = vpop.eup %1965 }
 0x18e   : > { %1977 = vpow2.f32 %v715_v21  ;;  %v717_v26 = vmul.f32 1.442695, %v662_v22  ;;  %v1784_v27 = vadd.f32 %v1783_v24, %v1782_v23  ;;  %v1785_v28 = vpop.f32.mrb[50].mxu0 }
 0x18f   : > { %v1968_v29 = vpop.eup %1967  ;;  %v1786_v30 = vpop.f32.mrb[51].mxu0 }
 0x190   : > { %v1970_v31 = vpop.eup %1969  ;;  %1979 = vpow2.f32 %v717_v26  ;;  %v609_v32 = vadd.f32 %v1784_v27, %v2683_v2  ;;  %v1787_v33 = vadd.f32 %v1786_v30, %v1785_v28  ;;  %v807_v34 = vpack.c.bf16 %v1968_v29, %v1966_v25 }
 0x191   : > { %v755_v35 = vadd.f32 1.0, %v1970_v31 }
 0x192   : > { %v1972_v36 = vpop.eup %1971  ;;  %v663_v37 = vsub.f32 0.0, %v609_v32  ;;  %v612_v38 = vadd.f32 %v1787_v33, %v2683_v2  ;;  %1676 = vmatmul.mubr.msk.bf16.gmra.mrb[32].mxu1 %vm905_vm1, %v807_v34 }
 0x193   : > { %v756_v39 = vadd.f32 1.0, %v1972_v36  ;;  %1083 = vmatprep.mubr.bf16.mxu1 %v2378_v0  ;;  %1981 = vrcp.f32 %v755_v35 }
 0x194   : > { %v719_v40 = vmul.f32 1.442695, %v663_v37  ;;  %v664_v41 = vsub.f32 0.0, %v612_v38  ;;  %v1788_v42 = vpop.f32.mrb[52].mxu0 }
 0x195   : > { %1983 = vrcp.f32 %v756_v39  ;;  %v1789_v43 = vpop.f32.mrb[53].mxu0  ;;  %v1974_v44 = vpop.eup %1973 }
 0x196   : > { %1985 = vpow2.f32 %v719_v40  ;;  %v721_v45 = vmul.f32 1.442695, %v664_v41  ;;  %v1790_v46 = vadd.f32 %v1789_v43, %v1788_v42  ;;  %v1791_v47 = vpop.f32.mrb[54].mxu0 }
 0x197   : > { %v1976_v48 = vpop.eup %1975  ;;  %v1792_v49 = vpop.f32.mrb[55].mxu0 }
 0x198   : > { %v1978_v50 = vpop.eup %1977  ;;  %1987 = vpow2.f32 %v721_v45  ;;  %v617_v51 = vadd.f32 %v1790_v46, %v2683_v2  ;;  %v1793_v52 = vadd.f32 %v1792_v49, %v1791_v47  ;;  %v808_v53 = vpack.c.bf16 %v1976_v48, %v1974_v44 }
 0x199   : > { %v757_v54 = vadd.f32 1.0, %v1978_v50 }
 0x19a   : > { %v1980_v55 = vpop.eup %1979  ;;  %v665_v56 = vsub.f32 0.0, %v617_v51  ;;  %v620_v57 = vadd.f32 %v1793_v52, %v2683_v2  ;;  %1677 = vmatmul.mubr.msk.bf16.gmra.mrb[36].mxu1 %vm905_vm1, %v808_v53 }
 0x19b   : > { %v758_v58 = vadd.f32 1.0, %v1980_v55  ;;  %1093 = vmatprep.mubr.bf16.mxu1 %v2378_v0  ;;  %1989 = vrcp.f32 %v757_v54 }
 0x19c   : > { %v723_v59 = vmul.f32 1.442695, %v665_v56  ;;  %v666_v60 = vsub.f32 0.0, %v620_v57  ;;  %v1794_v61 = vpop.f32.mrb[56].mxu0  ;;  %v830_v57 = vlaneseq }
 0x19d   : > { %1991 = vrcp.f32 %v758_v58  ;;  %v1795_v62 = vpop.f32.mrb[57].mxu0  ;;  %v1982_v63 = vpop.eup %1981 }
 0x19e   : > { %1993 = vpow2.f32 %v723_v59  ;;  %v725_v1 = vmul.f32 1.442695, %v666_v60  ;;  %v1796_v3 = vadd.f32 %v1795_v62, %v1794_v61  ;;  %v1797_v4 = vpop.f32.mrb[58].mxu0  ;;  %v831_v58 = vshrl.u32 %v830_v57, 7  ;;  %v828_v60 = vld [vmem:[%s2942_s4] sm:$0x3] }
 0x19f   : > { %v1984_v5 = vpop.eup %1983  ;;  %v1798_v6 = vpop.f32.mrb[59].mxu0 }
 0x1a0   : > { %v1986_v7 = vpop.eup %1985  ;;  %1995 = vpow2.f32 %v725_v1  ;;  %v625_v8 = vadd.f32 %v1796_v3, %v2683_v2  ;;  %v1799_v9 = vadd.f32 %v1798_v6, %v1797_v4  ;;  %v809_v10 = vpack.c.bf16 %v1984_v5, %v1982_v63 }
 0x1a1   : > { %v759_v11 = vadd.f32 1.0, %v1986_v7  ;;  %v832_v59 = vsub.s32 0, %v831_v58  ;;  %v836_v61 = vsub.s32 1, %v831_v58 }
 0x1a2   : > { %v1988_v12 = vpop.eup %1987  ;;  %v667_v13 = vsub.f32 0.0, %v625_v8  ;;  %v628_v14 = vadd.f32 %v1799_v9, %v2683_v2  ;;  %1678 = vmatmul.mubr.msk.bf16.gmra.mrb[40].mxu1 %vm905_vm1, %v809_v10 }
 0x1a3   : > { %v760_v15 = vadd.f32 1.0, %v1988_v12  ;;  %1103 = vmatprep.mubr.bf16.mxu1 %v2378_v0  ;;  %1997 = vrcp.f32 %v759_v11  ;;  %v2751_v62 = vrot.slane %v828_v60, %v832_v59  ;;  %v2753_v63 = vrot.slane %v828_v60, %v836_v61 }
 0x1a4   : > { %v727_v16 = vmul.f32 1.442695, %v667_v13  ;;  %v668_v17 = vsub.f32 0.0, %v628_v14  ;;  %v1800_v18 = vpop.f32.mrb[60].mxu0 }
 0x1a5   : > { %1999 = vrcp.f32 %v760_v15  ;;  %v1801_v19 = vpop.f32.mrb[61].mxu0  ;;  %v1990_v20 = vpop.eup %1989 }
 0x1a6   : > { %2001 = vpow2.f32 %v727_v16  ;;  %v729_v21 = vmul.f32 1.442695, %v668_v17  ;;  %v1802_v22 = vadd.f32 %v1801_v19, %v1800_v18  ;;  %v1803_v23 = vpop.f32.mrb[62].mxu0 }
 0x1a7   : > { %v1992_v24 = vpop.eup %1991  ;;  %v1804_v25 = vpop.f32.mrb[63].mxu0 }
 0x1a8   : > { %v1994_v26 = vpop.eup %1993  ;;  %2003 = vpow2.f32 %v729_v21  ;;  %v633_v27 = vadd.f32 %v1802_v22, %v2683_v2  ;;  %v1805_v28 = vadd.f32 %v1804_v25, %v1803_v23  ;;  %v810_v29 = vpack.c.bf16 %v1992_v24, %v1990_v20 }
 0x1a9   : > { %v761_v30 = vadd.f32 1.0, %v1994_v26 }
 0x1aa   : > { %v1996_v31 = vpop.eup %1995  ;;  %v669_v32 = vsub.f32 0.0, %v633_v27  ;;  %v636_v33 = vadd.f32 %v1805_v28, %v2683_v2  ;;  %1679 = vmatmul.mubr.msk.bf16.gmra.mrb[44].mxu1 %vm905_vm1, %v810_v29 }
 0x1ab   : > { %v762_v34 = vadd.f32 1.0, %v1996_v31  ;;  %1113 = vmatprep.mubr.bf16.mxu1 %v2378_v0  ;;  %2005 = vrcp.f32 %v761_v30 }
 0x1ac   : > { %v731_v35 = vmul.f32 1.442695, %v669_v32  ;;  %v670_v36 = vsub.f32 0.0, %v636_v33 }
 0x1ad   : > { %2007 = vrcp.f32 %v762_v34  ;;  %v1998_v37 = vpop.eup %1997 }
 0x1ae   : > { %2009 = vpow2.f32 %v731_v35  ;;  %v733_v38 = vmul.f32 1.442695, %v670_v36 }
 0x1af   : > { %v2000_v39 = vpop.eup %1999 }
 0x1b0   : > { %v2002_v40 = vpop.eup %2001  ;;  %2011 = vpow2.f32 %v733_v38  ;;  %v811_v41 = vpack.c.bf16 %v2000_v39, %v1998_v37 }
 0x1b1   : > { %v763_v42 = vadd.f32 1.0, %v2002_v40 }
 0x1b2   : > { %v2004_v43 = vpop.eup %2003  ;;  %1680 = vmatmul.mubr.msk.bf16.gmra.mrb[48].mxu1 %vm905_vm1, %v811_v41 }
 0x1b3   : > { %v764_v2 = vadd.f32 1.0, %v2004_v43  ;;  %1123 = vmatprep.mubr.bf16.mxu1 %v2378_v0  ;;  %2013 = vrcp.f32 %v763_v42 }
 0x1b5   : > { %2015 = vrcp.f32 %v764_v2  ;;  %v2006_v44 = vpop.eup %2005 }
 0x1b7   : > { %v2008_v45 = vpop.eup %2007 }
 0x1b8   : > { %v2010_v46 = vpop.eup %2009  ;;  %v812_v47 = vpack.c.bf16 %v2008_v45, %v2006_v44 }
 0x1b9   : > { %v765_v48 = vadd.f32 1.0, %v2010_v46 }
 0x1ba   : > { %v2012_v49 = vpop.eup %2011  ;;  %1681 = vmatmul.mubr.msk.bf16.gmra.mrb[52].mxu1 %vm905_vm1, %v812_v47 }
 0x1bb   : > { %v766_v50 = vadd.f32 1.0, %v2012_v49  ;;  %1133 = vmatprep.mubr.bf16.mxu1 %v2378_v0  ;;  %2017 = vrcp.f32 %v765_v48 }
 0x1bd   : > { %2019 = vrcp.f32 %v766_v50  ;;  %v2014_v51 = vpop.eup %2013 }
 0x1bf   : > { %v2016_v52 = vpop.eup %2015 }
 0x1c0   : > { %v813_v53 = vpack.c.bf16 %v2016_v52, %v2014_v51 }
 0x1c2   : > { %1682 = vmatmul.mubr.msk.bf16.gmra.mrb[56].mxu1 %vm905_vm1, %v813_v53 }
 0x1c3   : > { %1143 = vmatprep.mubr.bf16.mxu1 %v2378_v0 }
 0x1c5   : > { %v2018_v54 = vpop.eup %2017 }
 0x1c7   : > { %v2020_v55 = vpop.eup %2019 }
 0x1c8   : > { %v814_v56 = vpack.c.bf16 %v2020_v55, %v2018_v54 }
 0x1ca   : > { %1683 = vmatmul.mubr.msk.bf16.gmra.mrb[60].mxu1 %vm905_vm1, %v814_v56 }
 0x225   : > { %v995_v1 = vpop.f32.mrb[0].mxu1 }
 0x226   : > { %v996_v0 = vadd.f32 %v995_v1, %v2751_v62  ;;  %v997_v3 = vpop.f32.mrb[1].mxu1 }
 0x227   : > { %v998_v4 = vadd.f32 %v997_v3, %v2753_v63  ;;  %v999_v5 = vpop.f32.mrb[2].mxu1 }
 0x228   : > { %v1154_v6 = vsub.f32 0.0, %v996_v0  ;;  %v1000_v7 = vadd.f32 %v999_v5, %v2751_v62  ;;  %v1001_v8 = vpop.f32.mrb[3].mxu1 }
 0x229   : > { %v1155_v9 = vsub.f32 0.0, %v998_v4  ;;  %v1002_v10 = vadd.f32 %v1001_v8, %v2753_v63 }
 0x22a   : > { %v1218_v11 = vmul.f32 1.442695, %v1154_v6  ;;  %v1156_v12 = vsub.f32 0.0, %v1000_v7 }
 0x22b   : > { %v1220_v13 = vmul.f32 1.442695, %v1155_v9  ;;  %v1157_v14 = vsub.f32 0.0, %v1002_v10 }
 0x22c   : > { %2021 = vpow2.f32 %v1218_v11  ;;  %v1222_v15 = vmul.f32 1.442695, %v1156_v12 }
 0x22d   : > { %2023 = vpow2.f32 %v1220_v13  ;;  %v1224_v16 = vmul.f32 1.442695, %v1157_v14  ;;  %v1005_v17 = vpop.f32.mrb[4].mxu1 }
 0x22e   : > { %2025 = vpow2.f32 %v1222_v15  ;;  %v1006_v18 = vadd.f32 %v1005_v17, %v2751_v62  ;;  %v1007_v19 = vpop.f32.mrb[5].mxu1 }
 0x22f   : > { %2027 = vpow2.f32 %v1224_v16  ;;  %v1008_v20 = vadd.f32 %v1007_v19, %v2753_v63  ;;  %v1009_v21 = vpop.f32.mrb[6].mxu1 }
 0x230   : > { %v1158_v22 = vsub.f32 0.0, %v1006_v18  ;;  %v1010_v23 = vadd.f32 %v1009_v21, %v2751_v62  ;;  %v1011_v24 = vpop.f32.mrb[7].mxu1 }
 0x231   : > { %v1159_v25 = vsub.f32 0.0, %v1008_v20  ;;  %v1012_v26 = vadd.f32 %v1011_v24, %v2753_v63 }
 0x232   : > { %v1226_v27 = vmul.f32 1.442695, %v1158_v22  ;;  %v1160_v28 = vsub.f32 0.0, %v1010_v23 }
 0x233   : > { %v1228_v29 = vmul.f32 1.442695, %v1159_v25  ;;  %v1161_v30 = vsub.f32 0.0, %v1012_v26 }
 0x234   : > { %2029 = vpow2.f32 %v1226_v27  ;;  %v1230_v31 = vmul.f32 1.442695, %v1160_v28 }
 0x235   : > { %2031 = vpow2.f32 %v1228_v29  ;;  %v1232_v32 = vmul.f32 1.442695, %v1161_v30  ;;  %v1015_v33 = vpop.f32.mrb[8].mxu1 }
 0x236   : > { %v2022_v34 = vpop.eup %2021  ;;  %2033 = vpow2.f32 %v1230_v31  ;;  %v1016_v35 = vadd.f32 %v1015_v33, %v2751_v62  ;;  %v1017_v36 = vpop.f32.mrb[9].mxu1 }
 0x237   : > { %v2024_v37 = vpop.eup %2023  ;;  %v1346_v38 = vadd.f32 1.0, %v2022_v34  ;;  %2035 = vpow2.f32 %v1232_v32  ;;  %v1018_v39 = vadd.f32 %v1017_v36, %v2753_v63  ;;  %v1019_v40 = vpop.f32.mrb[10].mxu1 }
 0x238   : > { %v2026_v41 = vpop.eup %2025  ;;  %v1347_v42 = vadd.f32 1.0, %v2024_v37  ;;  %v1162_v43 = vsub.f32 0.0, %v1016_v35  ;;  %v1020_v2 = vadd.f32 %v1019_v40, %v2751_v62  ;;  %v1021_v44 = vpop.f32.mrb[11].mxu1 }
 0x239   : > { %v2028_v45 = vpop.eup %2027  ;;  %2037 = vrcp.f32 %v1346_v38  ;;  %v1348_v46 = vadd.f32 1.0, %v2026_v41  ;;  %v1163_v47 = vsub.f32 0.0, %v1018_v39  ;;  %v1022_v48 = vadd.f32 %v1021_v44, %v2753_v63 }
 0x23a   : > { %2039 = vrcp.f32 %v1347_v42  ;;  %v1349_v49 = vadd.f32 1.0, %v2028_v45  ;;  %v1234_v50 = vmul.f32 1.442695, %v1162_v43  ;;  %v1164_v51 = vsub.f32 0.0, %v1020_v2 }
 0x23b   : > { %2041 = vrcp.f32 %v1348_v46  ;;  %v1236_v52 = vmul.f32 1.442695, %v1163_v47  ;;  %v1165_v53 = vsub.f32 0.0, %v1022_v48 }
 0x23c   : > { %2043 = vrcp.f32 %v1349_v49  ;;  %v1238_v54 = vmul.f32 1.442695, %v1164_v51 }
 0x23d   : > { %2045 = vpow2.f32 %v1234_v50  ;;  %v1240_v55 = vmul.f32 1.442695, %v1165_v53  ;;  %v1025_v56 = vpop.f32.mrb[12].mxu1 }
 0x23e   : > { %v2030_v57 = vpop.eup %2029  ;;  %2047 = vpow2.f32 %v1236_v52  ;;  %v1026_v58 = vadd.f32 %v1025_v56, %v2751_v62  ;;  %v1027_v59 = vpop.f32.mrb[13].mxu1 }
 0x23f   : > { %v2032_v60 = vpop.eup %2031  ;;  %v1350_v61 = vadd.f32 1.0, %v2030_v57  ;;  %2049 = vpow2.f32 %v1238_v54  ;;  %v1028_v1 = vadd.f32 %v1027_v59, %v2753_v63  ;;  %v1029_v0 = vpop.f32.mrb[14].mxu1 }
 0x240   : > { %v2034_v3 = vpop.eup %2033  ;;  %v1351_v4 = vadd.f32 1.0, %v2032_v60  ;;  %2051 = vpow2.f32 %v1240_v55  ;;  %v1166_v5 = vsub.f32 0.0, %v1026_v58  ;;  %v1030_v6 = vadd.f32 %v1029_v0, %v2751_v62  ;;  %v1031_v7 = vpop.f32.mrb[15].mxu1 }
 0x241   : > { %v2036_v8 = vpop.eup %2035  ;;  %2053 = vrcp.f32 %v1350_v61  ;;  %v1352_v9 = vadd.f32 1.0, %v2034_v3  ;;  %v1167_v10 = vsub.f32 0.0, %v1028_v1  ;;  %v1032_v11 = vadd.f32 %v1031_v7, %v2753_v63 }
 0x242   : > { %2055 = vrcp.f32 %v1351_v4  ;;  %v1353_v12 = vadd.f32 1.0, %v2036_v8  ;;  %v1242_v13 = vmul.f32 1.442695, %v1166_v5  ;;  %v1168_v14 = vsub.f32 0.0, %v1030_v6 }
 0x243   : > { %v2038_v15 = vpop.eup %2037  ;;  %2057 = vrcp.f32 %v1352_v9  ;;  %v1244_v16 = vmul.f32 1.442695, %v1167_v10  ;;  %v1169_v17 = vsub.f32 0.0, %v1032_v11 }
 0x244   : > { %v2040_v18 = vpop.eup %2039  ;;  %1474 = vst [vmem:[%s2773_s11] sm:$0xff] %v2038_v15  ;;  %2059 = vrcp.f32 %v1353_v12  ;;  %v1246_v19 = vmul.f32 1.442695, %v1168_v14 }
 0x245   : > { %v2042_v20 = vpop.eup %2041  ;;  %1475 = vst [vmem:[%s2773_s11 + $0x8] sm:$0xff] %v2040_v18  ;;  %2061 = vpow2.f32 %v1242_v13  ;;  %v1248_v21 = vmul.f32 1.442695, %v1169_v17  ;;  %v1035_v22 = vpop.f32.mrb[16].mxu1 }
 0x246   : > { %v2044_v23 = vpop.eup %2043  ;;  %1476 = vst [vmem:[%s2773_s11 + $0x10] sm:$0xff] %v2042_v20  ;;  %2063 = vpow2.f32 %v1244_v16  ;;  %v1036_v24 = vadd.f32 %v1035_v22, %v2751_v62  ;;  %v1037_v25 = vpop.f32.mrb[17].mxu1 }
 0x247   : > { %v2046_v26 = vpop.eup %2045  ;;  %1477 = vst [vmem:[%s2773_s11 + $0x18] sm:$0xff] %v2044_v23  ;;  %2065 = vpow2.f32 %v1246_v19  ;;  %v1038_v27 = vadd.f32 %v1037_v25, %v2753_v63  ;;  %v1039_v28 = vpop.f32.mrb[18].mxu1 }
 0x248   : > { %v2048_v29 = vpop.eup %2047  ;;  %v1354_v30 = vadd.f32 1.0, %v2046_v26  ;;  %2067 = vpow2.f32 %v1248_v21  ;;  %v1170_v31 = vsub.f32 0.0, %v1036_v24  ;;  %v1040_v32 = vadd.f32 %v1039_v28, %v2751_v62  ;;  %v1041_v33 = vpop.f32.mrb[19].mxu1 }
 0x249   : > { %v2050_v34 = vpop.eup %2049  ;;  %v1355_v35 = vadd.f32 1.0, %v2048_v29  ;;  %v1171_v36 = vsub.f32 0.0, %v1038_v27  ;;  %v1042_v37 = vadd.f32 %v1041_v33, %v2753_v63 }
 0x24a   : > { %v2052_v38 = vpop.eup %2051  ;;  %2069 = vrcp.f32 %v1354_v30  ;;  %v1356_v39 = vadd.f32 1.0, %v2050_v34  ;;  %v1250_v40 = vmul.f32 1.442695, %v1170_v31  ;;  %v1172_v41 = vsub.f32 0.0, %v1040_v32 }
 0x24b   : > { %v2054_v42 = vpop.eup %2053  ;;  %2071 = vrcp.f32 %v1355_v35  ;;  %v1357_v43 = vadd.f32 1.0, %v2052_v38  ;;  %v1252_v2 = vmul.f32 1.442695, %v1171_v36  ;;  %v1173_v44 = vsub.f32 0.0, %v1042_v37 }
 0x24c   : > { %v2056_v45 = vpop.eup %2055  ;;  %1478 = vst [vmem:[%s2773_s11 + $0x20] sm:$0xff] %v2054_v42  ;;  %2073 = vrcp.f32 %v1356_v39  ;;  %v1254_v46 = vmul.f32 1.442695, %v1172_v41 }
 0x24d   : > { %v2058_v47 = vpop.eup %2057  ;;  %1479 = vst [vmem:[%s2773_s11 + $0x28] sm:$0xff] %v2056_v45  ;;  %2075 = vrcp.f32 %v1357_v43  ;;  %v1256_v48 = vmul.f32 1.442695, %v1173_v44  ;;  %v1045_v49 = vpop.f32.mrb[20].mxu1 }
 0x24e   : > { %v2060_v50 = vpop.eup %2059  ;;  %1480 = vst [vmem:[%s2773_s11 + $0x30] sm:$0xff] %v2058_v47  ;;  %2077 = vpow2.f32 %v1250_v40  ;;  %v1046_v51 = vadd.f32 %v1045_v49, %v2751_v62  ;;  %v1047_v52 = vpop.f32.mrb[21].mxu1 }
 0x24f   : > { %v2062_v53 = vpop.eup %2061  ;;  %1481 = vst [vmem:[%s2773_s11 + $0x38] sm:$0xff] %v2060_v50  ;;  %2079 = vpow2.f32 %v1252_v2  ;;  %v1048_v54 = vadd.f32 %v1047_v52, %v2753_v63  ;;  %v1049_v55 = vpop.f32.mrb[22].mxu1 }
 0x250   : > { %v2064_v56 = vpop.eup %2063  ;;  %v1358_v57 = vadd.f32 1.0, %v2062_v53  ;;  %2081 = vpow2.f32 %v1254_v46  ;;  %v1174_v58 = vsub.f32 0.0, %v1046_v51  ;;  %v1050_v59 = vadd.f32 %v1049_v55, %v2751_v62  ;;  %v1051_v60 = vpop.f32.mrb[23].mxu1 }
 0x251   : > { %v2066_v61 = vpop.eup %2065  ;;  %v1359_v1 = vadd.f32 1.0, %v2064_v56  ;;  %2083 = vpow2.f32 %v1256_v48  ;;  %v1175_v0 = vsub.f32 0.0, %v1048_v54  ;;  %v1052_v3 = vadd.f32 %v1051_v60, %v2753_v63 }
 0x252   : > { %v2068_v4 = vpop.eup %2067  ;;  %2085 = vrcp.f32 %v1358_v57  ;;  %v1360_v5 = vadd.f32 1.0, %v2066_v61  ;;  %v1258_v6 = vmul.f32 1.442695, %v1174_v58  ;;  %v1176_v7 = vsub.f32 0.0, %v1050_v59 }
 0x253   : > { %2087 = vrcp.f32 %v1359_v1  ;;  %v1361_v8 = vadd.f32 1.0, %v2068_v4  ;;  %v1260_v9 = vmul.f32 1.442695, %v1175_v0  ;;  %v1177_v10 = vsub.f32 0.0, %v1052_v3 }
 0x254   : > { %v2070_v11 = vpop.eup %2069  ;;  %2089 = vrcp.f32 %v1360_v5  ;;  %v1262_v12 = vmul.f32 1.442695, %v1176_v7 }
 0x255   : > { %v2072_v13 = vpop.eup %2071  ;;  %1482 = vst [vmem:[%s2773_s11 + $0x40] sm:$0xff] %v2070_v11  ;;  %2091 = vrcp.f32 %v1361_v8  ;;  %v1264_v14 = vmul.f32 1.442695, %v1177_v10  ;;  %v1055_v15 = vpop.f32.mrb[24].mxu1 }
 0x256   : > { %v2074_v16 = vpop.eup %2073  ;;  %1483 = vst [vmem:[%s2773_s11 + $0x48] sm:$0xff] %v2072_v13  ;;  %2093 = vpow2.f32 %v1258_v6  ;;  %v1056_v17 = vadd.f32 %v1055_v15, %v2751_v62  ;;  %v1057_v18 = vpop.f32.mrb[25].mxu1 }
 0x257   : > { %v2076_v19 = vpop.eup %2075  ;;  %1484 = vst [vmem:[%s2773_s11 + $0x50] sm:$0xff] %v2074_v16  ;;  %2095 = vpow2.f32 %v1260_v9  ;;  %v1058_v20 = vadd.f32 %v1057_v18, %v2753_v63  ;;  %v1059_v21 = vpop.f32.mrb[26].mxu1 }
 0x258   : > { %v2078_v22 = vpop.eup %2077  ;;  %1485 = vst [vmem:[%s2773_s11 + $0x58] sm:$0xff] %v2076_v19  ;;  %2097 = vpow2.f32 %v1262_v12  ;;  %v1178_v23 = vsub.f32 0.0, %v1056_v17  ;;  %v1060_v24 = vadd.f32 %v1059_v21, %v2751_v62  ;;  %v1061_v25 = vpop.f32.mrb[27].mxu1 }
 0x259   : > { %v2080_v26 = vpop.eup %2079  ;;  %v1362_v27 = vadd.f32 1.0, %v2078_v22  ;;  %2099 = vpow2.f32 %v1264_v14  ;;  %v1179_v28 = vsub.f32 0.0, %v1058_v20  ;;  %v1062_v29 = vadd.f32 %v1061_v25, %v2753_v63 }
 0x25a   : > { %v2082_v30 = vpop.eup %2081  ;;  %v1363_v31 = vadd.f32 1.0, %v2080_v26  ;;  %v1180_v32 = vsub.f32 0.0, %v1060_v24  ;;  %v1266_v35 = vmul.f32 1.442695, %v1178_v23 }
 0x25b   : > { %v2084_v33 = vpop.eup %2083  ;;  %2101 = vrcp.f32 %v1362_v27  ;;  %v1364_v34 = vadd.f32 1.0, %v2082_v30  ;;  %v1181_v36 = vsub.f32 0.0, %v1062_v29  ;;  %v1268_v39 = vmul.f32 1.442695, %v1179_v28 }
 0x25c   : > { %v2086_v37 = vpop.eup %2085  ;;  %2103 = vrcp.f32 %v1363_v31  ;;  %v1365_v38 = vadd.f32 1.0, %v2084_v33  ;;  %v1270_v41 = vmul.f32 1.442695, %v1180_v32 }
 0x25d   : > { %v2088_v40 = vpop.eup %2087  ;;  %1486 = vst [vmem:[%s2773_s11 + $0x60] sm:$0xff] %v2086_v37  ;;  %2105 = vrcp.f32 %v1364_v34  ;;  %v1065_v42 = vpop.f32.mrb[28].mxu1  ;;  %v1272_v2 = vmul.f32 1.442695, %v1181_v36 }
 0x25e   : > { %v2090_v43 = vpop.eup %2089  ;;  %1487 = vst [vmem:[%s2773_s11 + $0x68] sm:$0xff] %v2088_v40  ;;  %2107 = vrcp.f32 %v1365_v38  ;;  %v1066_v44 = vadd.f32 %v1065_v42, %v2751_v62  ;;  %v1067_v45 = vpop.f32.mrb[29].mxu1 }
 0x25f   : > { %v2092_v46 = vpop.eup %2091  ;;  %1488 = vst [vmem:[%s2773_s11 + $0x70] sm:$0xff] %v2090_v43  ;;  %2109 = vpow2.f32 %v1266_v35  ;;  %v1068_v47 = vadd.f32 %v1067_v45, %v2753_v63  ;;  %v1069_v48 = vpop.f32.mrb[30].mxu1 }
 0x260   : > { %v2094_v49 = vpop.eup %2093  ;;  %1489 = vst [vmem:[%s2773_s11 + $0x78] sm:$0xff] %v2092_v46  ;;  %2111 = vpow2.f32 %v1268_v39  ;;  %v1182_v50 = vsub.f32 0.0, %v1066_v44  ;;  %v1070_v51 = vadd.f32 %v1069_v48, %v2751_v62  ;;  %v1071_v52 = vpop.f32.mrb[31].mxu1 }
 0x261   : > { %v2096_v53 = vpop.eup %2095  ;;  %v1366_v54 = vadd.f32 1.0, %v2094_v49  ;;  %2113 = vpow2.f32 %v1270_v41  ;;  %v1183_v55 = vsub.f32 0.0, %v1068_v47  ;;  %v1072_v56 = vadd.f32 %v1071_v52, %v2753_v63 }
 0x262   : > { %v2098_v57 = vpop.eup %2097  ;;  %v1367_v58 = vadd.f32 1.0, %v2096_v53  ;;  %2115 = vpow2.f32 %v1272_v2  ;;  %v1184_v59 = vsub.f32 0.0, %v1070_v51  ;;  %v1274_v1 = vmul.f32 1.442695, %v1182_v50 }
 0x263   : > { %v2100_v60 = vpop.eup %2099  ;;  %2117 = vrcp.f32 %v1366_v54  ;;  %v1368_v61 = vadd.f32 1.0, %v2098_v57  ;;  %v1185_v0 = vsub.f32 0.0, %v1072_v56  ;;  %v1276_v4 = vmul.f32 1.442695, %v1183_v55 }
 0x264   : > { %2119 = vrcp.f32 %v1367_v58  ;;  %v1369_v3 = vadd.f32 1.0, %v2100_v60  ;;  %v1278_v6 = vmul.f32 1.442695, %v1184_v59 }
 0x265   : > { %v2102_v5 = vpop.eup %2101  ;;  %2121 = vrcp.f32 %v1368_v61  ;;  %v1075_v7 = vpop.f32.mrb[32].mxu1  ;;  %v1280_v9 = vmul.f32 1.442695, %v1185_v0 }
 0x266   : > { %v2104_v8 = vpop.eup %2103  ;;  %1490 = vst [vmem:[%s2773_s11 + $0x80] sm:$0xff] %v2102_v5  ;;  %2123 = vrcp.f32 %v1369_v3  ;;  %v1076_v10 = vadd.f32 %v1075_v7, %v2751_v62  ;;  %v1077_v11 = vpop.f32.mrb[33].mxu1 }
 0x267   : > { %v2106_v12 = vpop.eup %2105  ;;  %1491 = vst [vmem:[%s2773_s11 + $0x88] sm:$0xff] %v2104_v8  ;;  %2125 = vpow2.f32 %v1274_v1  ;;  %v1078_v13 = vadd.f32 %v1077_v11, %v2753_v63  ;;  %v1079_v14 = vpop.f32.mrb[34].mxu1 }
 0x268   : > { %v2108_v15 = vpop.eup %2107  ;;  %1492 = vst [vmem:[%s2773_s11 + $0x90] sm:$0xff] %v2106_v12  ;;  %2127 = vpow2.f32 %v1276_v4  ;;  %v1186_v16 = vsub.f32 0.0, %v1076_v10  ;;  %v1080_v17 = vadd.f32 %v1079_v14, %v2751_v62  ;;  %v1081_v18 = vpop.f32.mrb[35].mxu1 }
 0x269   : > { %v2110_v19 = vpop.eup %2109  ;;  %1493 = vst [vmem:[%s2773_s11 + $0x98] sm:$0xff] %v2108_v15  ;;  %2129 = vpow2.f32 %v1278_v6  ;;  %v1187_v20 = vsub.f32 0.0, %v1078_v13  ;;  %v1082_v21 = vadd.f32 %v1081_v18, %v2753_v63 }
 0x26a   : > { %v2112_v22 = vpop.eup %2111  ;;  %v1370_v23 = vadd.f32 1.0, %v2110_v19  ;;  %2131 = vpow2.f32 %v1280_v9  ;;  %v1188_v24 = vsub.f32 0.0, %v1080_v17  ;;  %v1282_v30 = vmul.f32 1.442695, %v1186_v16 }
 0x26b   : > { %v2114_v25 = vpop.eup %2113  ;;  %v1371_v26 = vadd.f32 1.0, %v2112_v22  ;;  %v1189_v27 = vsub.f32 0.0, %v1082_v21  ;;  %v1284_v33 = vmul.f32 1.442695, %v1187_v20 }
 0x26c   : > { %v2116_v28 = vpop.eup %2115  ;;  %2133 = vrcp.f32 %v1370_v23  ;;  %v1372_v29 = vadd.f32 1.0, %v2114_v25  ;;  %v1286_v36 = vmul.f32 1.442695, %v1188_v24 }
 0x26d   : > { %v2118_v31 = vpop.eup %2117  ;;  %2135 = vrcp.f32 %v1371_v26  ;;  %v1373_v32 = vadd.f32 1.0, %v2116_v28  ;;  %v1085_v34 = vpop.f32.mrb[36].mxu1  ;;  %v1288_v40 = vmul.f32 1.442695, %v1189_v27 }
 0x26e   : > { %v2120_v35 = vpop.eup %2119  ;;  %1494 = vst [vmem:[%s2773_s11 + $0xa0] sm:$0xff] %v2118_v31  ;;  %2137 = vrcp.f32 %v1372_v29  ;;  %v1086_v37 = vadd.f32 %v1085_v34, %v2751_v62  ;;  %v1087_v38 = vpop.f32.mrb[37].mxu1 }
 0x26f   : > { %v2122_v39 = vpop.eup %2121  ;;  %1495 = vst [vmem:[%s2773_s11 + $0xa8] sm:$0xff] %v2120_v35  ;;  %2139 = vrcp.f32 %v1373_v32  ;;  %v1088_v41 = vadd.f32 %v1087_v38, %v2753_v63  ;;  %v1089_v42 = vpop.f32.mrb[38].mxu1 }
 0x270   : > { %v2124_v43 = vpop.eup %2123  ;;  %1496 = vst [vmem:[%s2773_s11 + $0xb0] sm:$0xff] %v2122_v39  ;;  %2141 = vpow2.f32 %v1282_v30  ;;  %v1190_v2 = vsub.f32 0.0, %v1086_v37  ;;  %v1090_v44 = vadd.f32 %v1089_v42, %v2751_v62  ;;  %v1091_v45 = vpop.f32.mrb[39].mxu1 }
 0x271   : > { %v2126_v46 = vpop.eup %2125  ;;  %1497 = vst [vmem:[%s2773_s11 + $0xb8] sm:$0xff] %v2124_v43  ;;  %2143 = vpow2.f32 %v1284_v33  ;;  %v1191_v47 = vsub.f32 0.0, %v1088_v41  ;;  %v1092_v48 = vadd.f32 %v1091_v45, %v2753_v63 }
 0x272   : > { %v2128_v49 = vpop.eup %2127  ;;  %v1374_v50 = vadd.f32 1.0, %v2126_v46  ;;  %2145 = vpow2.f32 %v1286_v36  ;;  %v1192_v51 = vsub.f32 0.0, %v1090_v44  ;;  %v1290_v57 = vmul.f32 1.442695, %v1190_v2 }
 0x273   : > { %v2130_v52 = vpop.eup %2129  ;;  %v1375_v53 = vadd.f32 1.0, %v2128_v49  ;;  %2147 = vpow2.f32 %v1288_v40  ;;  %v1193_v54 = vsub.f32 0.0, %v1092_v48  ;;  %v1292_v59 = vmul.f32 1.442695, %v1191_v47 }
 0x274   : > { %v2132_v55 = vpop.eup %2131  ;;  %2149 = vrcp.f32 %v1374_v50  ;;  %v1376_v56 = vadd.f32 1.0, %v2130_v52  ;;  %v1294_v1 = vmul.f32 1.442695, %v1192_v51 }
 0x275   : > { %2151 = vrcp.f32 %v1375_v53  ;;  %v1377_v58 = vadd.f32 1.0, %v2132_v55  ;;  %v1095_v60 = vpop.f32.mrb[40].mxu1  ;;  %v1296_v5 = vmul.f32 1.442695, %v1193_v54 }
 0x276   : > { %v2134_v61 = vpop.eup %2133  ;;  %2153 = vrcp.f32 %v1376_v56  ;;  %v1096_v0 = vadd.f32 %v1095_v60, %v2751_v62  ;;  %v1097_v3 = vpop.f32.mrb[41].mxu1 }
 0x277   : > { %v2136_v4 = vpop.eup %2135  ;;  %1498 = vst [vmem:[%s2773_s11 + $0xc0] sm:$0xff] %v2134_v61  ;;  %2155 = vrcp.f32 %v1377_v58  ;;  %v1098_v6 = vadd.f32 %v1097_v3, %v2753_v63  ;;  %v1099_v7 = vpop.f32.mrb[42].mxu1 }
 0x278   : > { %v2138_v8 = vpop.eup %2137  ;;  %1499 = vst [vmem:[%s2773_s11 + $0xc8] sm:$0xff] %v2136_v4  ;;  %2157 = vpow2.f32 %v1290_v57  ;;  %v1194_v9 = vsub.f32 0.0, %v1096_v0  ;;  %v1100_v10 = vadd.f32 %v1099_v7, %v2751_v62  ;;  %v1101_v11 = vpop.f32.mrb[43].mxu1 }
 0x279   : > { %v2140_v12 = vpop.eup %2139  ;;  %1500 = vst [vmem:[%s2773_s11 + $0xd0] sm:$0xff] %v2138_v8  ;;  %2159 = vpow2.f32 %v1292_v59  ;;  %v1195_v13 = vsub.f32 0.0, %v1098_v6  ;;  %v1102_v14 = vadd.f32 %v1101_v11, %v2753_v63 }
 0x27a   : > { %v2142_v15 = vpop.eup %2141  ;;  %1501 = vst [vmem:[%s2773_s11 + $0xd8] sm:$0xff] %v2140_v12  ;;  %2161 = vpow2.f32 %v1294_v1  ;;  %v1298_v16 = vmul.f32 1.442695, %v1194_v9  ;;  %v1196_v17 = vsub.f32 0.0, %v1100_v10 }
 0x27b   : > { %v2144_v18 = vpop.eup %2143  ;;  %v1378_v19 = vadd.f32 1.0, %v2142_v15  ;;  %2163 = vpow2.f32 %v1296_v5  ;;  %v1197_v20 = vsub.f32 0.0, %v1102_v14  ;;  %v1300_v25 = vmul.f32 1.442695, %v1195_v13 }
 0x27c   : > { %v2146_v21 = vpop.eup %2145  ;;  %v1379_v22 = vadd.f32 1.0, %v2144_v18  ;;  %2165 = vpow2.f32 %v1298_v16  ;;  %v1302_v29 = vmul.f32 1.442695, %v1196_v17 }
 0x27d   : > { %v2148_v23 = vpop.eup %2147  ;;  %2167 = vrcp.f32 %v1378_v19  ;;  %v1380_v24 = vadd.f32 1.0, %v2146_v21  ;;  %v1105_v26 = vpop.f32.mrb[44].mxu1  ;;  %v1304_v33 = vmul.f32 1.442695, %v1197_v20 }
 0x27e   : > { %v2150_v27 = vpop.eup %2149  ;;  %2169 = vrcp.f32 %v1379_v22  ;;  %v1381_v28 = vadd.f32 1.0, %v2148_v23  ;;  %v1106_v30 = vadd.f32 %v1105_v26, %v2751_v62  ;;  %v1107_v31 = vpop.f32.mrb[45].mxu1 }
 0x27f   : > { %v2152_v32 = vpop.eup %2151  ;;  %1502 = vst [vmem:[%s2773_s11 + $0xe0] sm:$0xff] %v2150_v27  ;;  %2171 = vrcp.f32 %v1380_v24  ;;  %v1108_v34 = vadd.f32 %v1107_v31, %v2753_v63  ;;  %v1109_v35 = vpop.f32.mrb[46].mxu1 }
 0x280   : > { %v2154_v36 = vpop.eup %2153  ;;  %1503 = vst [vmem:[%s2773_s11 + $0xe8] sm:$0xff] %v2152_v32  ;;  %2173 = vrcp.f32 %v1381_v28  ;;  %v1198_v37 = vsub.f32 0.0, %v1106_v30  ;;  %v1110_v38 = vadd.f32 %v1109_v35, %v2751_v62  ;;  %v1111_v39 = vpop.f32.mrb[47].mxu1 }
 0x281   : > { %v2156_v40 = vpop.eup %2155  ;;  %1504 = vst [vmem:[%s2773_s11 + $0xf0] sm:$0xff] %v2154_v36  ;;  %2175 = vpow2.f32 %v1300_v25  ;;  %v1112_v41 = vadd.f32 %v1111_v39, %v2753_v63  ;;  %v1199_v2 = vsub.f32 0.0, %v1108_v34 }
 0x282   : > { %v2158_v42 = vpop.eup %2157  ;;  %1505 = vst [vmem:[%s2773_s11 + $0xf8] sm:$0xff] %v2156_v40  ;;  %2177 = vpow2.f32 %v1302_v29  ;;  %v1306_v43 = vmul.f32 1.442695, %v1198_v37  ;;  %v1200_v46 = vsub.f32 0.0, %v1110_v38 }
 0x283   : > { %v2160_v44 = vpop.eup %2159  ;;  %v1382_v45 = vadd.f32 1.0, %v2158_v42  ;;  %2179 = vpow2.f32 %v1304_v33  ;;  %v1201_v49 = vsub.f32 0.0, %v1112_v41  ;;  %v1308_v55 = vmul.f32 1.442695, %v1199_v2 }
 0x284   : > { %v2162_v47 = vpop.eup %2161  ;;  %v1383_v48 = vadd.f32 1.0, %v2160_v44  ;;  %2181 = vpow2.f32 %v1306_v43  ;;  %v1310_v60 = vmul.f32 1.442695, %v1200_v46 }
 0x285   : > { %v2164_v50 = vpop.eup %2163  ;;  %2183 = vrcp.f32 %v1382_v45  ;;  %v1384_v51 = vadd.f32 1.0, %v2162_v47  ;;  %v1115_v52 = vpop.f32.mrb[48].mxu1  ;;  %v1312_v3 = vmul.f32 1.442695, %v1201_v49 }
 0x286   : > { %v2166_v53 = vpop.eup %2165  ;;  %2185 = vrcp.f32 %v1383_v48  ;;  %v1385_v54 = vadd.f32 1.0, %v2164_v50  ;;  %v1116_v56 = vadd.f32 %v1115_v52, %v2751_v62  ;;  %v1117_v57 = vpop.f32.mrb[49].mxu1 }
 0x287   : > { %v2168_v58 = vpop.eup %2167  ;;  %2187 = vrcp.f32 %v1384_v51  ;;  %v1386_v59 = vadd.f32 1.0, %v2166_v53  ;;  %v1118_v61 = vadd.f32 %v1117_v57, %v2753_v63  ;;  %v1119_v1 = vpop.f32.mrb[50].mxu1 }
 0x288   : > { %v2170_v0 = vpop.eup %2169  ;;  %1506 = vst [vmem:[%s2773_s11 + $0x100] sm:$0xff] %v2168_v58  ;;  %2189 = vrcp.f32 %v1385_v54  ;;  %v1202_v4 = vsub.f32 0.0, %v1116_v56  ;;  %v1120_v5 = vadd.f32 %v1119_v1, %v2751_v62  ;;  %v1121_v6 = vpop.f32.mrb[51].mxu1 }
 0x289   : > { %v2172_v7 = vpop.eup %2171  ;;  %1507 = vst [vmem:[%s2773_s11 + $0x108] sm:$0xff] %v2170_v0  ;;  %2191 = vrcp.f32 %v1386_v59  ;;  %v1122_v8 = vadd.f32 %v1121_v6, %v2753_v63  ;;  %v1203_v11 = vsub.f32 0.0, %v1118_v61 }
 0x28a   : > { %v2174_v9 = vpop.eup %2173  ;;  %1508 = vst [vmem:[%s2773_s11 + $0x110] sm:$0xff] %v2172_v7  ;;  %2193 = vpow2.f32 %v1308_v55  ;;  %v1314_v10 = vmul.f32 1.442695, %v1202_v4  ;;  %v1204_v13 = vsub.f32 0.0, %v1120_v5 }
 0x28b   : > { %v2176_v12 = vpop.eup %2175  ;;  %1509 = vst [vmem:[%s2773_s11 + $0x118] sm:$0xff] %v2174_v9  ;;  %2195 = vpow2.f32 %v1310_v60  ;;  %v1205_v16 = vsub.f32 0.0, %v1122_v8  ;;  %v1316_v22 = vmul.f32 1.442695, %v1203_v11 }
 0x28c   : > { %v2178_v14 = vpop.eup %2177  ;;  %v1387_v15 = vadd.f32 1.0, %v2176_v12  ;;  %2197 = vpow2.f32 %v1312_v3  ;;  %v1318_v27 = vmul.f32 1.442695, %v1204_v13 }
 0x28d   : > { %v2180_v17 = vpop.eup %2179  ;;  %v1388_v18 = vadd.f32 1.0, %v2178_v14  ;;  %2199 = vpow2.f32 %v1314_v10  ;;  %v1125_v19 = vpop.f32.mrb[52].mxu1  ;;  %v1320_v31 = vmul.f32 1.442695, %v1205_v16 }
 0x28e   : > { %v2182_v20 = vpop.eup %2181  ;;  %2201 = vrcp.f32 %v1387_v15  ;;  %v1389_v21 = vadd.f32 1.0, %v2180_v17  ;;  %v1126_v23 = vadd.f32 %v1125_v19, %v2751_v62  ;;  %v1127_v24 = vpop.f32.mrb[53].mxu1 }
 0x28f   : > { %v2184_v25 = vpop.eup %2183  ;;  %2203 = vrcp.f32 %v1388_v18  ;;  %v1390_v26 = vadd.f32 1.0, %v2182_v20  ;;  %v1128_v28 = vadd.f32 %v1127_v24, %v2753_v63  ;;  %v1129_v29 = vpop.f32.mrb[54].mxu1 }
 0x290   : > { %v2186_v30 = vpop.eup %2185  ;;  %1510 = vst [vmem:[%s2773_s11 + $0x120] sm:$0xff] %v2184_v25  ;;  %2205 = vrcp.f32 %v1389_v21  ;;  %v1206_v32 = vsub.f32 0.0, %v1126_v23  ;;  %v1130_v33 = vadd.f32 %v1129_v29, %v2751_v62  ;;  %v1131_v34 = vpop.f32.mrb[55].mxu1 }
 0x291   : > { %v2188_v35 = vpop.eup %2187  ;;  %1511 = vst [vmem:[%s2773_s11 + $0x128] sm:$0xff] %v2186_v30  ;;  %2207 = vrcp.f32 %v1390_v26  ;;  %v1207_v36 = vsub.f32 0.0, %v1128_v28  ;;  %v1132_v37 = vadd.f32 %v1131_v34, %v2753_v63 }
 0x292   : > { %v2190_v38 = vpop.eup %2189  ;;  %1512 = vst [vmem:[%s2773_s11 + $0x130] sm:$0xff] %v2188_v35  ;;  %2209 = vpow2.f32 %v1316_v22  ;;  %v1322_v39 = vmul.f32 1.442695, %v1206_v32  ;;  %v1208_v40 = vsub.f32 0.0, %v1130_v33 }
 0x293   : > { %v2192_v41 = vpop.eup %2191  ;;  %1513 = vst [vmem:[%s2773_s11 + $0x138] sm:$0xff] %v2190_v38  ;;  %2211 = vpow2.f32 %v1318_v27  ;;  %v1324_v42 = vmul.f32 1.442695, %v1207_v36  ;;  %v1209_v43 = vsub.f32 0.0, %v1132_v37 }
 0x294   : > { %v2194_v2 = vpop.eup %2193  ;;  %1514 = vst [vmem:[%s2773_s11 + $0x140] sm:$0xff] %v2192_v41  ;;  %2213 = vpow2.f32 %v1320_v31  ;;  %v1326_v49 = vmul.f32 1.442695, %v1208_v40 }
 0x295   : > { %v2196_v44 = vpop.eup %2195  ;;  %v1391_v45 = vadd.f32 1.0, %v2194_v2  ;;  %2215 = vpow2.f32 %v1322_v39  ;;  %v1135_v46 = vpop.f32.mrb[56].mxu1  ;;  %v1328_v54 = vmul.f32 1.442695, %v1209_v43 }
 0x296   : > { %v2198_v47 = vpop.eup %2197  ;;  %v1392_v48 = vadd.f32 1.0, %v2196_v44  ;;  %2217 = vpow2.f32 %v1324_v42  ;;  %v1136_v50 = vadd.f32 %v1135_v46, %v2751_v62  ;;  %v1137_v51 = vpop.f32.mrb[57].mxu1 }
 0x297   : > { %v2200_v52 = vpop.eup %2199  ;;  %2219 = vrcp.f32 %v1391_v45  ;;  %v1393_v53 = vadd.f32 1.0, %v2198_v47  ;;  %v1138_v55 = vadd.f32 %v1137_v51, %v2753_v63  ;;  %v1139_v56 = vpop.f32.mrb[58].mxu1 }
 0x298   : > { %v2202_v57 = vpop.eup %2201  ;;  %2221 = vrcp.f32 %v1392_v48  ;;  %v1394_v58 = vadd.f32 1.0, %v2200_v52  ;;  %v1210_v59 = vsub.f32 0.0, %v1136_v50  ;;  %v1140_v60 = vadd.f32 %v1139_v56, %v2751_v62  ;;  %v1141_v61 = vpop.f32.mrb[59].mxu1 }
 0x299   : > { %v2204_v1 = vpop.eup %2203  ;;  %1515 = vst [vmem:[%s2773_s11 + $0x148] sm:$0xff] %v2202_v57  ;;  %2223 = vrcp.f32 %v1393_v53  ;;  %v1211_v0 = vsub.f32 0.0, %v1138_v55  ;;  %v1142_v3 = vadd.f32 %v1141_v61, %v2753_v63 }
 0x29a   : > { %v2206_v4 = vpop.eup %2205  ;;  %1516 = vst [vmem:[%s2773_s11 + $0x150] sm:$0xff] %v2204_v1  ;;  %2225 = vrcp.f32 %v1394_v58  ;;  %v1330_v5 = vmul.f32 1.442695, %v1210_v59  ;;  %v1212_v6 = vsub.f32 0.0, %v1140_v60 }
 0x29b   : > { %v2208_v7 = vpop.eup %2207  ;;  %1517 = vst [vmem:[%s2773_s11 + $0x158] sm:$0xff] %v2206_v4  ;;  %2227 = vpow2.f32 %v1326_v49  ;;  %v1332_v8 = vmul.f32 1.442695, %v1211_v0  ;;  %v1213_v9 = vsub.f32 0.0, %v1142_v3 }
 0x29c   : > { %v2210_v10 = vpop.eup %2209  ;;  %1518 = vst [vmem:[%s2773_s11 + $0x160] sm:$0xff] %v2208_v7  ;;  %2229 = vpow2.f32 %v1328_v54  ;;  %v1334_v16 = vmul.f32 1.442695, %v1212_v6 }
 0x29d   : > { %v2212_v11 = vpop.eup %2211  ;;  %v1395_v12 = vadd.f32 1.0, %v2210_v10  ;;  %2231 = vpow2.f32 %v1330_v5  ;;  %v1145_v13 = vpop.f32.mrb[60].mxu1  ;;  %v1336_v21 = vmul.f32 1.442695, %v1213_v9 }
 0x29e   : > { %v2214_v14 = vpop.eup %2213  ;;  %v1396_v15 = vadd.f32 1.0, %v2212_v11  ;;  %2233 = vpow2.f32 %v1332_v8  ;;  %v1146_v17 = vadd.f32 %v1145_v13, %v2751_v62  ;;  %v1147_v18 = vpop.f32.mrb[61].mxu1 }
 0x29f   : > { %v2216_v19 = vpop.eup %2215  ;;  %2235 = vrcp.f32 %v1395_v12  ;;  %v1397_v20 = vadd.f32 1.0, %v2214_v14  ;;  %v1148_v22 = vadd.f32 %v1147_v18, %v2753_v63  ;;  %v1149_v23 = vpop.f32.mrb[62].mxu1 }
 0x2a0   : > { %v2218_v24 = vpop.eup %2217  ;;  %2237 = vrcp.f32 %v1396_v15  ;;  %v1398_v25 = vadd.f32 1.0, %v2216_v19  ;;  %v1214_v26 = vsub.f32 0.0, %v1146_v17  ;;  %v1150_v27 = vadd.f32 %v1149_v23, %v2751_v62  ;;  %v1151_v28 = vpop.f32.mrb[63].mxu1 }
 0x2a1   : > { %v2220_v29 = vpop.eup %2219  ;;  %2239 = vrcp.f32 %v1397_v20  ;;  %v1399_v30 = vadd.f32 1.0, %v2218_v24  ;;  %v1215_v31 = vsub.f32 0.0, %v1148_v22  ;;  %v1152_v32 = vadd.f32 %v1151_v28, %v2753_v63 }
 0x2a2   : > { %v2222_v33 = vpop.eup %2221  ;;  %1519 = vst [vmem:[%s2773_s11 + $0x168] sm:$0xff] %v2220_v29  ;;  %2241 = vrcp.f32 %v1398_v25  ;;  %v1338_v34 = vmul.f32 1.442695, %v1214_v26  ;;  %v1216_v62 = vsub.f32 0.0, %v1150_v27 }
 0x2a3   : > { %v2224_v35 = vpop.eup %2223  ;;  %1520 = vst [vmem:[%s2773_s11 + $0x170] sm:$0xff] %v2222_v33  ;;  %2243 = vrcp.f32 %v1399_v30  ;;  %v1340_v36 = vmul.f32 1.442695, %v1215_v31  ;;  %v1217_v39 = vsub.f32 0.0, %v1152_v32 }
 0x2a4   : > { %v2226_v37 = vpop.eup %2225  ;;  %1521 = vst [vmem:[%s2773_s11 + $0x178] sm:$0xff] %v2224_v35  ;;  %2245 = vpow2.f32 %v1334_v16  ;;  %v1342_v44 = vmul.f32 1.442695, %v1216_v62 }
 0x2a5   : > { %v2228_v38 = vpop.eup %2227  ;;  %1522 = vst [vmem:[%s2773_s11 + $0x180] sm:$0xff] %v2226_v37  ;;  %2247 = vpow2.f32 %v1336_v21  ;;  %v1344_v47 = vmul.f32 1.442695, %v1217_v39 }
 0x2a6   : > { %v2230_v40 = vpop.eup %2229  ;;  %v1400_v41 = vadd.f32 1.0, %v2228_v38  ;;  %2249 = vpow2.f32 %v1338_v34 }
 0x2a7   : > { %v2232_v63 = vpop.eup %2231  ;;  %v1401_v42 = vadd.f32 1.0, %v2230_v40  ;;  %2251 = vpow2.f32 %v1340_v36 }
 0x2a8   : > { %v2234_v43 = vpop.eup %2233  ;;  %2253 = vrcp.f32 %v1400_v41  ;;  %v1402_v2 = vadd.f32 1.0, %v2232_v63 }
 0x2a9   : > { %v2236_v45 = vpop.eup %2235  ;;  %2255 = vrcp.f32 %v1401_v42  ;;  %v1403_v46 = vadd.f32 1.0, %v2234_v43 }
 0x2aa   : > { %v2238_v48 = vpop.eup %2237  ;;  %1523 = vst [vmem:[%s2773_s11 + $0x188] sm:$0xff] %v2236_v45  ;;  %2257 = vrcp.f32 %v1402_v2 }
 0x2ab   : > { %v2240_v49 = vpop.eup %2239  ;;  %1524 = vst [vmem:[%s2773_s11 + $0x190] sm:$0xff] %v2238_v48  ;;  %2259 = vrcp.f32 %v1403_v46 }
 0x2ac   : > { %v2242_v50 = vpop.eup %2241  ;;  %1525 = vst [vmem:[%s2773_s11 + $0x198] sm:$0xff] %v2240_v49  ;;  %2261 = vpow2.f32 %v1342_v44 }
 0x2ad   : > { %v2244_v51 = vpop.eup %2243  ;;  %1526 = vst [vmem:[%s2773_s11 + $0x1a0] sm:$0xff] %v2242_v50  ;;  %2263 = vpow2.f32 %v1344_v47 }
 0x2ae   : > { %v2246_v52 = vpop.eup %2245  ;;  %1527 = vst [vmem:[%s2773_s11 + $0x1a8] sm:$0xff] %v2244_v51 }
 0x2af   : > { %v2248_v53 = vpop.eup %2247  ;;  %v1404_v54 = vadd.f32 1.0, %v2246_v52 }
 0x2b0   : > { %v2250_v55 = vpop.eup %2249  ;;  %v1405_v56 = vadd.f32 1.0, %v2248_v53 }
 0x2b1   : > { %v2252_v57 = vpop.eup %2251  ;;  %2265 = vrcp.f32 %v1404_v54  ;;  %v1406_v58 = vadd.f32 1.0, %v2250_v55 }
 0x2b2   : > { %v2254_v59 = vpop.eup %2253  ;;  %2267 = vrcp.f32 %v1405_v56  ;;  %v1407_v60 = vadd.f32 1.0, %v2252_v57 }
 0x2b3   : > { %v2256_v61 = vpop.eup %2255  ;;  %1528 = vst [vmem:[%s2773_s11 + $0x1b0] sm:$0xff] %v2254_v59  ;;  %2269 = vrcp.f32 %v1406_v58 }
 0x2b4   : > { %v2258_v1 = vpop.eup %2257  ;;  %1529 = vst [vmem:[%s2773_s11 + $0x1b8] sm:$0xff] %v2256_v61  ;;  %2271 = vrcp.f32 %v1407_v60 }
 0x2b5   : > { %v2260_v0 = vpop.eup %2259  ;;  %1530 = vst [vmem:[%s2773_s11 + $0x1c0] sm:$0xff] %v2258_v1 }
 0x2b6   : > { %v2262_v3 = vpop.eup %2261  ;;  %1531 = vst [vmem:[%s2773_s11 + $0x1c8] sm:$0xff] %v2260_v0 }
 0x2b7   : > { %v2264_v4 = vpop.eup %2263  ;;  %v1408_v5 = vadd.f32 1.0, %v2262_v3 }
 0x2b8   : > { %v1409_v6 = vadd.f32 1.0, %v2264_v4 }
 0x2b9   : > { %2273 = vrcp.f32 %v1408_v5 }
 0x2ba   : > { %2275 = vrcp.f32 %v1409_v6 }
 0x2bb   : > { %v2266_v7 = vpop.eup %2265 }
 0x2bc   : > { %v2268_v8 = vpop.eup %2267  ;;  %1532 = vst [vmem:[%s2773_s11 + $0x1d0] sm:$0xff] %v2266_v7 }
 0x2bd   : > { %v2270_v9 = vpop.eup %2269  ;;  %1533 = vst [vmem:[%s2773_s11 + $0x1d8] sm:$0xff] %v2268_v8 }
 0x2be   : > { %v2272_v10 = vpop.eup %2271  ;;  %1534 = vst [vmem:[%s2773_s11 + $0x1e0] sm:$0xff] %v2270_v9 }
 0x2bf   : > { %1535 = vst [vmem:[%s2773_s11 + $0x1e8] sm:$0xff] %v2272_v10 }
 0x2c3   : > { %v2274_v11 = vpop.eup %2273 }
 0x2c4   : > { %v2276_v12 = vpop.eup %2275  ;;  %1536 = vst [vmem:[%s2773_s11 + $0x1f0] sm:$0xff] %v2274_v11 }
 0x2c5   : > { %1537 = vst [vmem:[%s2773_s11 + $0x1f8] sm:$0xff] %v2276_v12 }
 0x2c6   : > { %2320 = shalt.err (!%p2317_p2)
}
 0x2c7   : > { %s2321_s7 = scalar_lea.hbm %s2890_s12, 8192  ;;  %s2325_s10 = scalar_lea.hbm %s2943_s5, 16384 }
 0x2c8   : > { %p2322_p4 = scmp.ne.s32.totalorder %s2890_s12, %s2321_s7  ;;  %p2326_p9 = scmp.lt.u32.totalorder %s2890_s12, %s2943_s5 }
 0x2c9   : > { %p2327_p1 = scmp.lt.u32.totalorder %s2325_s10, %s2321_s7  ;;  %p2329_p6 = scmp.lt.u32.totalorder %s2321_s7, %s2890_s12 }
 0x2ca   : > { %p2323_p5 = pnand %p2322_p4, %p2950_p11 }
 0x2cb   : > { %p2328_p3 = por %p2327_p1, %p2326_p9 }
 0x2cc   : > { %p2324_p7 = pneg %p2323_p5 }
 0x2cd   : > { %p2330_p12 = por %p2329_p6, %p2328_p3 }
 0x2cf   : > { %p2331_p13 = pnand %p2330_p12, %p2324_p7 }
 0x2d1   : > { %2334 = shalt.err (!%p2331_p13)
}
 0x2d2   : > { %s2380_s25 = smov 256   ;;  %s2381_s17 = smov 16  }
 0x2d3   : > { %1808 = dma.vmem_to_hbm [thread:$0]  (%p2950_p11), %s2892_s13, 8192, %s2890_s12, %s1539_s14, %s2380_s25, %s2380_s25, %s2381_s17  }
 0x2d4 PF: > { %s1568_s26 = sand.u32 1, %s2361_s18   ;;  %p2951_p8 = scmp.ne.s32.totalorder %s2948_s6, 0 }
 0x2d5   : > { %p2952_p10 = scmp.ge.s32.totalorder %s2373_s21, 2  ;;  %s1569_s15 = scalar_lea.sflag [#allocation4], %s1568_s26 }
 0x2d7   : > { %p1815_p0 = pnand %p2952_p10, %p2951_p8 }
 0x2d9   : > { %2356 = dma.done.wait (!%p1815_p0), %s1569_s15, 8192  }
 0x2da   : > { %2358 = vsyncadd (!%p1815_p0), %s1569_s15, 4294959104  ;;  %p18_p2 = scmp.ge.s32.totalorder %s2437_s24, 4   ;;  %s2953_s18 = smov %s2365_s19 }
 0x2db   : > { %s2954_s19 = smov %s2369_s20  ;;  %s2955_s20 = smov %s2449_s27 }
 0x2dc   : > { %s2956_s21 = smov %s2437_s24  ;;  %20 = sbr.rel (!%p18_p2) target bundleno = 5 (0x5), region = 85 }
 0x2e3   :  { %1574 = vsyncpa [#allocation3], 1 }
 0x2e4   :  { %1576 = vsyncpa [#allocation3 + $0x1], 1 }
 0x2e5   :  { %1577 = vsyncpa [#allocation4], 1 }
 0x2e6   :  { %1579 = vsyncpa [#allocation4 + $0x1], 1 }

</bundles_post_ra>
